<compile_context>
chip_gen: v6e
topology: v6e:2x2x1
jax: 0.10.0
libtpu: 0.0.40
codegen_flags: <defaults>
</compile_context>

<pallas_src>
import jax
import jax.numpy as jnp
from jax.experimental import pallas as pl
from jax.experimental.pallas import tpu as pltpu

EPS = 1e-5            # nn.BatchNorm2d default eps
CDT = jnp.bfloat16    # MXU input dtype (f32 accumulation)


# ------------------------------ Pallas kernel ------------------------------- #

def _mm(a, b):
    """bf16 x bf16 matmul with f32 accumulation on the MXU."""
    return jnp.dot(a, b, preferred_element_type=jnp.float32)


def _bn_relu(x, gamma, beta):
    """Training-mode BatchNorm2d + ReLU over a (rows, C) f32 pre-activation.

    Two-pass statistics (mean, then centered sum of squares) in f32 for
    numerical safety; normalize folded into one mul + one add per element.
    """
    inv_n = 1.0 / x.shape[0]
    mean = jnp.sum(x, axis=0, keepdims=True) * inv_n
    xc = x - mean
    var = jnp.sum(xc * xc, axis=0, keepdims=True) * inv_n
    scale = gamma * jax.lax.rsqrt(var + EPS)
    return jnp.maximum(xc * scale + beta, 0.0)


def _fused_lapgan_kernel(x_ref, w1_ref, b1_ref,
                         w2_ref, b2_ref, g2_ref, be2_ref,
                         w3_ref, b3_ref, g3_ref, be3_ref,
                         w4_ref, b4_ref, g4_ref, be4_ref,
                         w5_ref, b5_ref, g5_ref, be5_ref,
                         w6_ref, b6_ref,
                         o_ref):
    rows2 = x_ref.shape[0]       # B * (H/4) * (W/4)
    rows3 = rows2 // 4           # B * (H/8) * (W/8)

    # ---- layer 1: Conv(C->64) + ReLU, block-diag weight emits layer-2 im2col
    #      directly: (rows2, 16C) @ (16C, 256) -> columns (kh1, kw1, co64)
    g1 = jnp.maximum(_mm(x_ref[...], w1_ref[...]) + b1_ref[...], 0.0).astype(CDT)

    # ---- layer 2: Conv(64->128) + BN + ReLU   (single fused matmul, K=256)
    h2 = _bn_relu(_mm(g1, w2_ref[...]) + b2_ref[...], g2_ref[...], be2_ref[...])

    # ---- layer 3: Conv(128->256) + BN + ReLU
    #      im2col = lane-concat of the 4 tap row-blocks (tap-major row layout),
    #      exact permutation, 128-lane aligned slices.  One bf16 cast of h2.
    im3 = jnp.concatenate(
        [h2[t * rows3:(t + 1) * rows3, :] for t in range(4)], axis=1).astype(CDT)
    h3 = _bn_relu(_mm(im3, w3_ref[...]) + b3_ref[...],
                  g3_ref[...], be3_ref[...]).astype(CDT)                  # (rows3, 256)

    # ---- layer 4: ConvT(256->128) + BN + ReLU  (one matmul, N=512; depth->space
    #      = sublane-concat of the 4 128-lane column blocks)
    y4 = _mm(h3, w4_ref[...]) + b4_ref[...]                               # (rows3, 512)
    h4p = jnp.concatenate([y4[:, 128 * t:128 * (t + 1)] for t in range(4)], axis=0)
    h4 = _bn_relu(h4p, g4_ref[...], be4_ref[...]).astype(CDT)             # (rows2, 128)

    # ---- layer 5: ConvT(128->64, Cout zero-padded to 128) + BN + ReLU
    y5 = _mm(h4, w5_ref[...]) + b5_ref[...]                               # (rows2, 512)
    h5p = jnp.concatenate([y5[:, 128 * t:128 * (t + 1)] for t in range(4)], axis=0)
    h5 = _bn_relu(h5p, g5_ref[...], be5_ref[...]).astype(CDT)             # (rows1, 128)

    # ---- layer 6: ConvT(64->C) + Tanh, exact-size (rows1, 4C) store (no padding)
    o_ref[...] = jnp.tanh(_mm(h5, w6_ref[...]) + b6_ref[...])


# ------------------------------- host wrapper -------------------------------- #

def lapgan_generator_level3(x_nchw, p):
    """Forward pass of LAPGAN_Generator_level3.  x: (B, C, H, W) -> (B, C, H, W)."""
    B, C, H, W = x_nchw.shape
    assert H % 8 == 0 and W % 8 == 0, "spatial dims must be divisible by 8"
    H3, W3 = H // 8, W // 8
    rows3 = B * H3 * W3
    rows2, rows1 = 4 * rows3, 16 * rows3
    assert rows3 % 8 == 0, "need B*H*W % 512 == 0 for clean (8,128) sublane tiling"
    f32 = jnp.float32

    # input: grouped im2col for (layer1 folded into layer2's im2col), Z-order rows.
    # rows ordered (kh2, kw2, b, i3, j3); columns (kh1, kw1, kh0, kw0, c).
    xg = (x_nchw.astype(f32)
          .transpose(0, 2, 3, 1)                      # (B, H, W, C)
          .reshape(B, H3, 2, 2, 2, W3, 2, 2, 2, C)    # b,i3,kh2,kh1,kh0,j3,kw2,kw1,kw0,c
          .transpose(2, 6, 0, 1, 5, 3, 7, 4, 8, 9)    # kh2,kw2,b,i3,j3 | kh1,kw1,kh0,kw0,c
          .reshape(rows2, 16 * C)
          .astype(CDT))

    # layer 1: Conv(C->64) as a block-diagonal matmul emitting layer-2's im2col
    w1m = p["w1"].transpose(2, 3, 1, 0).reshape(4 * C, 64)          # rows (kh0,kw0,c)
    w1g = jnp.kron(jnp.eye(4, dtype=f32), w1m).astype(CDT)          # (16C, 256) block-diag
    b1g = jnp.tile(p["b1"], 4).reshape(1, 256).astype(f32)

    # conv / convT weights as single fused matmul operands (bf16)
    w2m = p["w2"].transpose(2, 3, 1, 0).reshape(4 * 64, 128).astype(CDT)    # (256,128)
    w3m = p["w3"].transpose(2, 3, 1, 0).reshape(4 * 128, 256).astype(CDT)   # (512,256)
    w4m = p["w4"].transpose(0, 2, 3, 1).reshape(256, 4 * 128).astype(CDT)   # (256,512)
    # layer 5: pad Cout 64 -> 128 (zeros) so all lane slices stay 128-aligned
    w5m = jnp.pad(p["w5"].transpose(0, 2, 3, 1), ((0, 0), (0, 0), (0, 0), (0, 64)))
    w5m = w5m.reshape(128, 4 * 128).astype(CDT)                             # (128,512)
    # layer 6: pad Cin 64 -> 128 (zeros) to match the padded layer-5 output
    w6m = jnp.pad(p["w6"].transpose(0, 2, 3, 1).reshape(64, 4 * C),
                  ((0, 64), (0, 0))).astype(CDT)                            # (128, 4C)

    r = lambda v: v.reshape(1, -1).astype(f32)
    b2, b3 = r(p["b2"]), r(p["b3"])
    b4 = r(jnp.tile(p["b4"], 4))                                            # (1,512)
    b5 = r(jnp.tile(jnp.pad(p["b5"], (0, 64)), 4))                          # (1,512)
    b6 = r(jnp.tile(p["b6"], 4))                                            # (1,4C)
    g2, be2 = r(p["g2"]), r(p["be2"])
    g3, be3 = r(p["g3"]), r(p["be3"])
    g4, be4 = r(p["g4"]), r(p["be4"])
    g5, be5 = r(jnp.pad(p["g5"], (0, 64))), r(jnp.pad(p["be5"], (0, 64)))

    # explicit VMEM budget derived from the real peak live set (review: v7x 64 MiB)
    weight_bytes = sum(int(a.size) * a.dtype.itemsize
                       for a in (w1g, w2m, w3m, w4m, w5m, w6m))
    act_f32_elems = (rows2 * 256 * 2 + rows2 * 128 * 2 + rows3 * 512 * 2
                     + rows3 * 256 + rows2 * 512 * 2 + rows1 * 128 * 2 + rows1 * 4 * C)
    est = (int(xg.size) * 2 + rows1 * 4 * C * 4
           + weight_bytes + act_f32_elems * 4 + (1 << 20))
    vmem_limit = int(min(96 << 20, max(8 << 20, 2 * est)))

    vmem = pl.BlockSpec(memory_space=pltpu.MemorySpace.VMEM)
    out = pl.pallas_call(
        _fused_lapgan_kernel,
        out_shape=jax.ShapeDtypeStruct((rows1, 4 * C), jnp.float32),
        in_specs=[vmem] * 21,
        out_specs=vmem,
        compiler_params=pltpu.CompilerParams(vmem_limit_bytes=vmem_limit),
    )(xg, w1g, b1g,
      w2m, b2, g2, be2,
      w3m, b3, g3, be3,
      w4m, b4, g4, be4,
      w5m, b5, g5, be5,
      w6m, b6)

    # output rows are in (kh1, kw1, kh2, kw2, b, i3, j3) order, columns (kh0, kw0, c):
    # untangle the Z-order back to NCHW (tiny XLA pass over exact-size output).
    y = (out.reshape(2, 2, 2, 2, B, H3, W3, 2, 2, C)
         .transpose(4, 9, 5, 2, 0, 7, 6, 3, 1, 8)     # b, c, i3,kh2,kh1,kh0, j3,kw2,kw1,kw0
         .reshape(B, C, H, W))
    return y


# --------------------------- parameters & reference -------------------------- #

def init_params(key, channels):
    """Deterministic init mimicking PyTorch default (uniform +-1/sqrt(fan_in))."""
    def conv_init(k, co, ci, ksz):
        bound = 1.0 / float((ci * ksz * ksz) ** 0.5)
        k1, k2 = jax.random.split(k)
        w = jax.random.uniform(k1, (co, ci, ksz, ksz), jnp.float32, -bound, bound)
        b = jax.random.uniform(k2, (co,), jnp.float32, -bound, bound)
        return w, b

    def convT_init(k, ci, co, ksz):
        bound = 1.0 / float((co * ksz * ksz) ** 0.5)
        k1, k2 = jax.random.split(k)
        w = jax.random.uniform(k1, (ci, co, ksz, ksz), jnp.float32, -bound, bound)
        b = jax.random.uniform(k2, (co,), jnp.float32, -bound, bound)
        return w, b

    ks = jax.random.split(key, 6)
    p = {}
    p["w1"], p["b1"] = conv_init(ks[0], 64, channels, 2)
    p["w2"], p["b2"] = conv_init(ks[1], 128, 64, 2)
    p["g2"], p["be2"] = jnp.ones((128,), jnp.float32), jnp.zeros((128,), jnp.float32)
    p["w3"], p["b3"] = conv_init(ks[2], 256, 128, 2)
    p["g3"], p["be3"] = jnp.ones((256,), jnp.float32), jnp.zeros((256,), jnp.float32)
    p["w4"], p["b4"] = convT_init(ks[3], 256, 128, 2)
    p["g4"], p["be4"] = jnp.ones((128,), jnp.float32), jnp.zeros((128,), jnp.float32)
    p["w5"], p["b5"] = convT_init(ks[4], 128, 64, 2)
    p["g5"], p["be5"] = jnp.ones((64,), jnp.float32), jnp.zeros((64,), jnp.float32)
    p["w6"], p["b6"] = convT_init(ks[5], 64, channels, 2)
    return p


def _reference_forward(x_nchw, p):
    """Pure-JAX f32 reference (same math, no Pallas) for a sanity check."""
    hi = jax.lax.Precision.HIGHEST
    a = x_nchw.transpose(0, 2, 3, 1).astype(jnp.float32)

    def conv(a, w, b):
        B, H, W, C = a.shape
        Co = w.shape[0]
        x = (a.reshape(B, H // 2, 2, W // 2, 2, C)
             .transpose(0, 1, 3, 2, 4, 5)
             .reshape(B * (H // 2) * (W // 2), 4 * C))
        wm = w.transpose(2, 3, 1, 0).reshape(4 * C, Co)
        y = jnp.dot(x, wm, precision=hi) + b
        return y.reshape(B, H // 2, W // 2, Co)

    def convT(a, w, b):
        B, H, W, C = a.shape
        Co = w.shape[1]
        wm = w.transpose(0, 2, 3, 1).reshape(C, 4 * Co)
        y = jnp.dot(a.reshape(B * H * W, C), wm, precision=hi) + jnp.tile(b, 4)
        return (y.reshape(B, H, W, 2, 2, Co)
                .transpose(0, 1, 3, 2, 4, 5)
                .reshape(B, 2 * H, 2 * W, Co))

    def bn(a, g, be):
        mean = a.mean(axis=(0, 1, 2), keepdims=True)
        var = a.var(axis=(0, 1, 2), keepdims=True)
        return (a - mean) * jax.lax.rsqrt(var + EPS) * g + be

    a = jax.nn.relu(conv(a, p["w1"], p["b1"]))
    a = jax.nn.relu(bn(conv(a, p["w2"], p["b2"]), p["g2"], p["be2"]))
    a = jax.nn.relu(bn(conv(a, p["w3"], p["b3"]), p["g3"], p["be3"]))
    a = jax.nn.relu(bn(convT(a, p["w4"], p["b4"]), p["g4"], p["be4"]))
    a = jax.nn.relu(bn(convT(a, p["w5"], p["b5"]), p["g5"], p["be5"]))
    a = jnp.tanh(convT(a, p["w6"], p["b6"]))
    return a.transpose(0, 3, 1, 2)


# ----------------------------------- main ------------------------------------ #

if __name__ == "__main__":
    channels = 1          # MNIST-style
    B, H, W = 2, 16, 16   # spatial must be divisible by 8 (three stride-2 convs)

    key = jax.random.PRNGKey(0)
    kx, kp = jax.random.split(key)
    x = jax.random.normal(kx, (B, channels, H, W), dtype=jnp.float32)
    params = init_params(kp, channels)

    fwd = jax.jit(lambda xx: lapgan_generator_level3(xx, params))
    out = fwd(x)
    jax.block_until_ready(out)

    assert out.shape == (B, channels, H, W), out.shape
    assert out.dtype == jnp.float32
    assert bool(jnp.all(jnp.isfinite(out)))
    assert bool(jnp.all(jnp.abs(out) <= 1.0 + 1e-6))  # tanh output range

    # numerical sanity check vs pure-JAX f32 reference (bf16 MXU -> loose atol)
    ref = _reference_forward(x, params)
    max_err = float(jnp.max(jnp.abs(out - ref)))
    assert max_err < 0.15, f"mismatch vs reference: max abs err = {max_err}"

    print("KERNEL_OK")
</pallas_src>

<mosaic_0001>
module attributes {stable_mosaic.version = 11 : i64} {
  func.func @_fused_lapgan_kernel(%arg0: memref<32x16xbf16, #tpu.memory_space<vmem>>, %arg1: memref<16x256xbf16, #tpu.memory_space<vmem>>, %arg2: memref<1x256xf32, #tpu.memory_space<vmem>>, %arg3: memref<256x128xbf16, #tpu.memory_space<vmem>>, %arg4: memref<1x128xf32, #tpu.memory_space<vmem>>, %arg5: memref<1x128xf32, #tpu.memory_space<vmem>>, %arg6: memref<1x128xf32, #tpu.memory_space<vmem>>, %arg7: memref<512x256xbf16, #tpu.memory_space<vmem>>, %arg8: memref<1x256xf32, #tpu.memory_space<vmem>>, %arg9: memref<1x256xf32, #tpu.memory_space<vmem>>, %arg10: memref<1x256xf32, #tpu.memory_space<vmem>>, %arg11: memref<256x512xbf16, #tpu.memory_space<vmem>>, %arg12: memref<1x512xf32, #tpu.memory_space<vmem>>, %arg13: memref<1x128xf32, #tpu.memory_space<vmem>>, %arg14: memref<1x128xf32, #tpu.memory_space<vmem>>, %arg15: memref<128x512xbf16, #tpu.memory_space<vmem>>, %arg16: memref<1x512xf32, #tpu.memory_space<vmem>>, %arg17: memref<1x128xf32, #tpu.memory_space<vmem>>, %arg18: memref<1x128xf32, #tpu.memory_space<vmem>>, %arg19: memref<128x4xbf16, #tpu.memory_space<vmem>>, %arg20: memref<1x4xf32, #tpu.memory_space<vmem>>, %arg21: memref<128x4xf32, #tpu.memory_space<vmem>>) attributes {dimension_semantics = [], scalar_prefetch = 0 : i64, scratch_operands = 0 : i64, tpu.core_type = #tpu.core_type<tc>} {
    %c0 = arith.constant 0 : index
    %c0_0 = arith.constant 0 : index
    %0 = vector.load %arg0[%c0, %c0_0] : memref<32x16xbf16, #tpu.memory_space<vmem>>, vector<32x16xbf16>
    %c0_1 = arith.constant 0 : index
    %c0_2 = arith.constant 0 : index
    %1 = vector.load %arg1[%c0_1, %c0_2] : memref<16x256xbf16, #tpu.memory_space<vmem>>, vector<16x256xbf16>
    %cst = arith.constant dense<0.000000e+00> : vector<32x256xf32>
    %2 = tpu.matmul %0, %1, %cst {dimension_numbers = #tpu.dot_dimension_numbers<[1], [0], [0], [1], [0, 0, 1, 1], [], []>} : vector<32x16xbf16>, vector<16x256xbf16>, vector<32x256xf32> -> vector<32x256xf32>
    %c0_3 = arith.constant 0 : index
    %c0_4 = arith.constant 0 : index
    %3 = vector.load %arg2[%c0_3, %c0_4] : memref<1x256xf32, #tpu.memory_space<vmem>>, vector<1x256xf32>
    %4 = vector.broadcast %3 : vector<1x256xf32> to vector<32x256xf32>
    %5 = arith.addf %2, %4 : vector<32x256xf32>
    %cst_5 = arith.constant 0.000000e+00 : f32
    %6 = vector.broadcast %cst_5 : f32 to vector<32x256xf32>
    %7 = arith.maximumf %5, %6 : vector<32x256xf32>
    %8 = arith.truncf %7 : vector<32x256xf32> to vector<32x256xbf16>
    %c0_6 = arith.constant 0 : index
    %c0_7 = arith.constant 0 : index
    %9 = vector.load %arg3[%c0_6, %c0_7] : memref<256x128xbf16, #tpu.memory_space<vmem>>, vector<256x128xbf16>
    %cst_8 = arith.constant dense<0.000000e+00> : vector<32x128xf32>
    %10 = tpu.matmul %8, %9, %cst_8 {dimension_numbers = #tpu.dot_dimension_numbers<[1], [0], [0], [1], [0, 0, 1, 1], [], []>} : vector<32x256xbf16>, vector<256x128xbf16>, vector<32x128xf32> -> vector<32x128xf32>
    %c0_9 = arith.constant 0 : index
    %c0_10 = arith.constant 0 : index
    %11 = vector.load %arg4[%c0_9, %c0_10] : memref<1x128xf32, #tpu.memory_space<vmem>>, vector<1x128xf32>
    %12 = vector.broadcast %11 : vector<1x128xf32> to vector<32x128xf32>
    %13 = arith.addf %10, %12 : vector<32x128xf32>
    %c0_11 = arith.constant 0 : index
    %c0_12 = arith.constant 0 : index
    %14 = vector.load %arg5[%c0_11, %c0_12] : memref<1x128xf32, #tpu.memory_space<vmem>>, vector<1x128xf32>
    %c0_13 = arith.constant 0 : index
    %c0_14 = arith.constant 0 : index
    %15 = vector.load %arg6[%c0_13, %c0_14] : memref<1x128xf32, #tpu.memory_space<vmem>>, vector<1x128xf32>
    %cst_15 = arith.constant dense<0.000000e+00> : vector<128xf32>
    %16 = vector.multi_reduction <add>, %13, %cst_15 [0] : vector<32x128xf32> to vector<128xf32>
    %17 = vector.shape_cast %16 : vector<128xf32> to vector<1x128xf32>
    %cst_16 = arith.constant 3.125000e-02 : f32
    %18 = vector.broadcast %cst_16 : f32 to vector<1x128xf32>
    %19 = arith.mulf %17, %18 : vector<1x128xf32>
    %20 = vector.broadcast %19 : vector<1x128xf32> to vector<32x128xf32>
    %21 = arith.subf %13, %20 : vector<32x128xf32>
    %22 = arith.mulf %21, %21 : vector<32x128xf32>
    %cst_17 = arith.constant dense<0.000000e+00> : vector<128xf32>
    %23 = vector.multi_reduction <add>, %22, %cst_17 [0] : vector<32x128xf32> to vector<128xf32>
    %24 = vector.shape_cast %23 : vector<128xf32> to vector<1x128xf32>
    %cst_18 = arith.constant 3.125000e-02 : f32
    %25 = vector.broadcast %cst_18 : f32 to vector<1x128xf32>
    %26 = arith.mulf %24, %25 : vector<1x128xf32>
    %cst_19 = arith.constant 9.99999974E-6 : f32
    %27 = vector.broadcast %cst_19 : f32 to vector<1x128xf32>
    %28 = arith.addf %26, %27 : vector<1x128xf32>
    %29 = math.rsqrt %28 : vector<1x128xf32>
    %30 = arith.mulf %14, %29 : vector<1x128xf32>
    %31 = vector.broadcast %30 : vector<1x128xf32> to vector<32x128xf32>
    %32 = arith.mulf %21, %31 : vector<32x128xf32>
    %33 = vector.broadcast %15 : vector<1x128xf32> to vector<32x128xf32>
    %34 = arith.addf %32, %33 : vector<32x128xf32>
    %cst_20 = arith.constant 0.000000e+00 : f32
    %35 = vector.broadcast %cst_20 : f32 to vector<32x128xf32>
    %36 = arith.maximumf %34, %35 : vector<32x128xf32>
    %37 = vector.extract_strided_slice %36 {offsets = [0, 0], sizes = [8, 128], strides = [1, 1]} : vector<32x128xf32> to vector<8x128xf32>
    %38 = vector.extract_strided_slice %36 {offsets = [8, 0], sizes = [8, 128], strides = [1, 1]} : vector<32x128xf32> to vector<8x128xf32>
    %39 = vector.extract_strided_slice %36 {offsets = [16, 0], sizes = [8, 128], strides = [1, 1]} : vector<32x128xf32> to vector<8x128xf32>
    %40 = vector.extract_strided_slice %36 {offsets = [24, 0], sizes = [8, 128], strides = [1, 1]} : vector<32x128xf32> to vector<8x128xf32>
    %41 = tpu.concatenate %37, %38, %39, %40 in 1 : vector<8x128xf32>, vector<8x128xf32>, vector<8x128xf32>, vector<8x128xf32> -> vector<8x512xf32>
    %42 = arith.truncf %41 : vector<8x512xf32> to vector<8x512xbf16>
    %c0_21 = arith.constant 0 : index
    %c0_22 = arith.constant 0 : index
    %43 = vector.load %arg7[%c0_21, %c0_22] : memref<512x256xbf16, #tpu.memory_space<vmem>>, vector<512x256xbf16>
    %cst_23 = arith.constant dense<0.000000e+00> : vector<8x256xf32>
    %44 = tpu.matmul %42, %43, %cst_23 {dimension_numbers = #tpu.dot_dimension_numbers<[1], [0], [0], [1], [0, 0, 1, 1], [], []>} : vector<8x512xbf16>, vector<512x256xbf16>, vector<8x256xf32> -> vector<8x256xf32>
    %c0_24 = arith.constant 0 : index
    %c0_25 = arith.constant 0 : index
    %45 = vector.load %arg8[%c0_24, %c0_25] : memref<1x256xf32, #tpu.memory_space<vmem>>, vector<1x256xf32>
    %46 = vector.broadcast %45 : vector<1x256xf32> to vector<8x256xf32>
    %47 = arith.addf %44, %46 : vector<8x256xf32>
    %c0_26 = arith.constant 0 : index
    %c0_27 = arith.constant 0 : index
    %48 = vector.load %arg9[%c0_26, %c0_27] : memref<1x256xf32, #tpu.memory_space<vmem>>, vector<1x256xf32>
    %c0_28 = arith.constant 0 : index
    %c0_29 = arith.constant 0 : index
    %49 = vector.load %arg10[%c0_28, %c0_29] : memref<1x256xf32, #tpu.memory_space<vmem>>, vector<1x256xf32>
    %cst_30 = arith.constant dense<0.000000e+00> : vector<256xf32>
    %50 = vector.multi_reduction <add>, %47, %cst_30 [0] : vector<8x256xf32> to vector<256xf32>
    %51 = vector.shape_cast %50 : vector<256xf32> to vector<1x256xf32>
    %cst_31 = arith.constant 1.250000e-01 : f32
    %52 = vector.broadcast %cst_31 : f32 to vector<1x256xf32>
    %53 = arith.mulf %51, %52 : vector<1x256xf32>
    %54 = vector.broadcast %53 : vector<1x256xf32> to vector<8x256xf32>
    %55 = arith.subf %47, %54 : vector<8x256xf32>
    %56 = arith.mulf %55, %55 : vector<8x256xf32>
    %cst_32 = arith.constant dense<0.000000e+00> : vector<256xf32>
    %57 = vector.multi_reduction <add>, %56, %cst_32 [0] : vector<8x256xf32> to vector<256xf32>
    %58 = vector.shape_cast %57 : vector<256xf32> to vector<1x256xf32>
    %cst_33 = arith.constant 1.250000e-01 : f32
    %59 = vector.broadcast %cst_33 : f32 to vector<1x256xf32>
    %60 = arith.mulf %58, %59 : vector<1x256xf32>
    %cst_34 = arith.constant 9.99999974E-6 : f32
    %61 = vector.broadcast %cst_34 : f32 to vector<1x256xf32>
    %62 = arith.addf %60, %61 : vector<1x256xf32>
    %63 = math.rsqrt %62 : vector<1x256xf32>
    %64 = arith.mulf %48, %63 : vector<1x256xf32>
    %65 = vector.broadcast %64 : vector<1x256xf32> to vector<8x256xf32>
    %66 = arith.mulf %55, %65 : vector<8x256xf32>
    %67 = vector.broadcast %49 : vector<1x256xf32> to vector<8x256xf32>
    %68 = arith.addf %66, %67 : vector<8x256xf32>
    %cst_35 = arith.constant 0.000000e+00 : f32
    %69 = vector.broadcast %cst_35 : f32 to vector<8x256xf32>
    %70 = arith.maximumf %68, %69 : vector<8x256xf32>
    %71 = arith.truncf %70 : vector<8x256xf32> to vector<8x256xbf16>
    %c0_36 = arith.constant 0 : index
    %c0_37 = arith.constant 0 : index
    %72 = vector.load %arg11[%c0_36, %c0_37] : memref<256x512xbf16, #tpu.memory_space<vmem>>, vector<256x512xbf16>
    %cst_38 = arith.constant dense<0.000000e+00> : vector<8x512xf32>
    %73 = tpu.matmul %71, %72, %cst_38 {dimension_numbers = #tpu.dot_dimension_numbers<[1], [0], [0], [1], [0, 0, 1, 1], [], []>} : vector<8x256xbf16>, vector<256x512xbf16>, vector<8x512xf32> -> vector<8x512xf32>
    %c0_39 = arith.constant 0 : index
    %c0_40 = arith.constant 0 : index
    %74 = vector.load %arg12[%c0_39, %c0_40] : memref<1x512xf32, #tpu.memory_space<vmem>>, vector<1x512xf32>
    %75 = vector.broadcast %74 : vector<1x512xf32> to vector<8x512xf32>
    %76 = arith.addf %73, %75 : vector<8x512xf32>
    %77 = vector.extract_strided_slice %76 {offsets = [0, 0], sizes = [8, 128], strides = [1, 1]} : vector<8x512xf32> to vector<8x128xf32>
    %78 = vector.extract_strided_slice %76 {offsets = [0, 128], sizes = [8, 128], strides = [1, 1]} : vector<8x512xf32> to vector<8x128xf32>
    %79 = vector.extract_strided_slice %76 {offsets = [0, 256], sizes = [8, 128], strides = [1, 1]} : vector<8x512xf32> to vector<8x128xf32>
    %80 = vector.extract_strided_slice %76 {offsets = [0, 384], sizes = [8, 128], strides = [1, 1]} : vector<8x512xf32> to vector<8x128xf32>
    %81 = tpu.concatenate %77, %78, %79, %80 in 0 : vector<8x128xf32>, vector<8x128xf32>, vector<8x128xf32>, vector<8x128xf32> -> vector<32x128xf32>
    %c0_41 = arith.constant 0 : index
    %c0_42 = arith.constant 0 : index
    %82 = vector.load %arg13[%c0_41, %c0_42] : memref<1x128xf32, #tpu.memory_space<vmem>>, vector<1x128xf32>
    %c0_43 = arith.constant 0 : index
    %c0_44 = arith.constant 0 : index
    %83 = vector.load %arg14[%c0_43, %c0_44] : memref<1x128xf32, #tpu.memory_space<vmem>>, vector<1x128xf32>
    %cst_45 = arith.constant dense<0.000000e+00> : vector<128xf32>
    %84 = vector.multi_reduction <add>, %81, %cst_45 [0] : vector<32x128xf32> to vector<128xf32>
    %85 = vector.shape_cast %84 : vector<128xf32> to vector<1x128xf32>
    %cst_46 = arith.constant 3.125000e-02 : f32
    %86 = vector.broadcast %cst_46 : f32 to vector<1x128xf32>
    %87 = arith.mulf %85, %86 : vector<1x128xf32>
    %88 = vector.broadcast %87 : vector<1x128xf32> to vector<32x128xf32>
    %89 = arith.subf %81, %88 : vector<32x128xf32>
    %90 = arith.mulf %89, %89 : vector<32x128xf32>
    %cst_47 = arith.constant dense<0.000000e+00> : vector<128xf32>
    %91 = vector.multi_reduction <add>, %90, %cst_47 [0] : vector<32x128xf32> to vector<128xf32>
    %92 = vector.shape_cast %91 : vector<128xf32> to vector<1x128xf32>
    %cst_48 = arith.constant 3.125000e-02 : f32
    %93 = vector.broadcast %cst_48 : f32 to vector<1x128xf32>
    %94 = arith.mulf %92, %93 : vector<1x128xf32>
    %cst_49 = arith.constant 9.99999974E-6 : f32
    %95 = vector.broadcast %cst_49 : f32 to vector<1x128xf32>
    %96 = arith.addf %94, %95 : vector<1x128xf32>
    %97 = math.rsqrt %96 : vector<1x128xf32>
    %98 = arith.mulf %82, %97 : vector<1x128xf32>
    %99 = vector.broadcast %98 : vector<1x128xf32> to vector<32x128xf32>
    %100 = arith.mulf %89, %99 : vector<32x128xf32>
    %101 = vector.broadcast %83 : vector<1x128xf32> to vector<32x128xf32>
    %102 = arith.addf %100, %101 : vector<32x128xf32>
    %cst_50 = arith.constant 0.000000e+00 : f32
    %103 = vector.broadcast %cst_50 : f32 to vector<32x128xf32>
    %104 = arith.maximumf %102, %103 : vector<32x128xf32>
    %105 = arith.truncf %104 : vector<32x128xf32> to vector<32x128xbf16>
    %c0_51 = arith.constant 0 : index
    %c0_52 = arith.constant 0 : index
    %106 = vector.load %arg15[%c0_51, %c0_52] : memref<128x512xbf16, #tpu.memory_space<vmem>>, vector<128x512xbf16>
    %cst_53 = arith.constant dense<0.000000e+00> : vector<32x512xf32>
    %107 = tpu.matmul %105, %106, %cst_53 {dimension_numbers = #tpu.dot_dimension_numbers<[1], [0], [0], [1], [0, 0, 1, 1], [], []>} : vector<32x128xbf16>, vector<128x512xbf16>, vector<32x512xf32> -> vector<32x512xf32>
    %c0_54 = arith.constant 0 : index
    %c0_55 = arith.constant 0 : index
    %108 = vector.load %arg16[%c0_54, %c0_55] : memref<1x512xf32, #tpu.memory_space<vmem>>, vector<1x512xf32>
    %109 = vector.broadcast %108 : vector<1x512xf32> to vector<32x512xf32>
    %110 = arith.addf %107, %109 : vector<32x512xf32>
    %111 = vector.extract_strided_slice %110 {offsets = [0, 0], sizes = [32, 128], strides = [1, 1]} : vector<32x512xf32> to vector<32x128xf32>
    %112 = vector.extract_strided_slice %110 {offsets = [0, 128], sizes = [32, 128], strides = [1, 1]} : vector<32x512xf32> to vector<32x128xf32>
    %113 = vector.extract_strided_slice %110 {offsets = [0, 256], sizes = [32, 128], strides = [1, 1]} : vector<32x512xf32> to vector<32x128xf32>
    %114 = vector.extract_strided_slice %110 {offsets = [0, 384], sizes = [32, 128], strides = [1, 1]} : vector<32x512xf32> to vector<32x128xf32>
    %115 = tpu.concatenate %111, %112, %113, %114 in 0 : vector<32x128xf32>, vector<32x128xf32>, vector<32x128xf32>, vector<32x128xf32> -> vector<128x128xf32>
    %c0_56 = arith.constant 0 : index
    %c0_57 = arith.constant 0 : index
    %116 = vector.load %arg17[%c0_56, %c0_57] : memref<1x128xf32, #tpu.memory_space<vmem>>, vector<1x128xf32>
    %c0_58 = arith.constant 0 : index
    %c0_59 = arith.constant 0 : index
    %117 = vector.load %arg18[%c0_58, %c0_59] : memref<1x128xf32, #tpu.memory_space<vmem>>, vector<1x128xf32>
    %cst_60 = arith.constant dense<0.000000e+00> : vector<128xf32>
    %118 = vector.multi_reduction <add>, %115, %cst_60 [0] : vector<128x128xf32> to vector<128xf32>
    %119 = vector.shape_cast %118 : vector<128xf32> to vector<1x128xf32>
    %cst_61 = arith.constant 7.812500e-03 : f32
    %120 = vector.broadcast %cst_61 : f32 to vector<1x128xf32>
    %121 = arith.mulf %119, %120 : vector<1x128xf32>
    %122 = vector.broadcast %121 : vector<1x128xf32> to vector<128x128xf32>
    %123 = arith.subf %115, %122 : vector<128x128xf32>
    %124 = arith.mulf %123, %123 : vector<128x128xf32>
    %cst_62 = arith.constant dense<0.000000e+00> : vector<128xf32>
    %125 = vector.multi_reduction <add>, %124, %cst_62 [0] : vector<128x128xf32> to vector<128xf32>
    %126 = vector.shape_cast %125 : vector<128xf32> to vector<1x128xf32>
    %cst_63 = arith.constant 7.812500e-03 : f32
    %127 = vector.broadcast %cst_63 : f32 to vector<1x128xf32>
    %128 = arith.mulf %126, %127 : vector<1x128xf32>
    %cst_64 = arith.constant 9.99999974E-6 : f32
    %129 = vector.broadcast %cst_64 : f32 to vector<1x128xf32>
    %130 = arith.addf %128, %129 : vector<1x128xf32>
    %131 = math.rsqrt %130 : vector<1x128xf32>
    %132 = arith.mulf %116, %131 : vector<1x128xf32>
    %133 = vector.broadcast %132 : vector<1x128xf32> to vector<128x128xf32>
    %134 = arith.mulf %123, %133 : vector<128x128xf32>
    %135 = vector.broadcast %117 : vector<1x128xf32> to vector<128x128xf32>
    %136 = arith.addf %134, %135 : vector<128x128xf32>
    %cst_65 = arith.constant 0.000000e+00 : f32
    %137 = vector.broadcast %cst_65 : f32 to vector<128x128xf32>
    %138 = arith.maximumf %136, %137 : vector<128x128xf32>
    %139 = arith.truncf %138 : vector<128x128xf32> to vector<128x128xbf16>
    %c0_66 = arith.constant 0 : index
    %c0_67 = arith.constant 0 : index
    %140 = vector.load %arg19[%c0_66, %c0_67] : memref<128x4xbf16, #tpu.memory_space<vmem>>, vector<128x4xbf16>
    %cst_68 = arith.constant dense<0.000000e+00> : vector<128x4xf32>
    %141 = tpu.matmul %139, %140, %cst_68 {dimension_numbers = #tpu.dot_dimension_numbers<[1], [0], [0], [1], [0, 0, 1, 1], [], []>} : vector<128x128xbf16>, vector<128x4xbf16>, vector<128x4xf32> -> vector<128x4xf32>
    %c0_69 = arith.constant 0 : index
    %c0_70 = arith.constant 0 : index
    %142 = vector.load %arg20[%c0_69, %c0_70] : memref<1x4xf32, #tpu.memory_space<vmem>>, vector<1x4xf32>
    %143 = vector.broadcast %142 : vector<1x4xf32> to vector<128x4xf32>
    %144 = arith.addf %141, %143 : vector<128x4xf32>
    %145 = math.tanh %144 : vector<128x4xf32>
    %c0_71 = arith.constant 0 : index
    %c0_72 = arith.constant 0 : index
    %146 = vector.load %arg21[%c0_71, %c0_72] : memref<128x4xf32, #tpu.memory_space<vmem>>, vector<128x4xf32>
    tpu.vector_store %arg21[%c0_71, %c0_72], %145 {strides = array<i32>} : memref<128x4xf32, #tpu.memory_space<vmem>>, vector<128x4xf32>,
    return
  }
}

</mosaic_0001>

<bundles_post_ra>
// kernel: tile.15
= control target key start
LH: loop header
LB: loop body
LE: loop exit
PB: predicated region body
PF: predicated region fallthrough
CT: control target
= control target key end

     0   :  { %s22_s0 = inlined_call_operand.vmem [shape: f32[64], index: 0, kind: input, shape index: {}]   ;;  %s23_s1 = inlined_call_operand.vmem [shape: f32[4,64], index: 1, kind: output, shape index: {}]  }
   0x1   :  { %v4_v0 = vld [vmem:[%s22_s0] ss:$0 sm:$0xff] }
   0x2   :  { %5 = vst [vmem:[%s23_s1] sm:$0xf] %v4_v0 }

// kernel: tile.16
= control target key start
LH: loop header
LB: loop body
LE: loop exit
PB: predicated region body
PF: predicated region fallthrough
CT: control target
= control target key end

     0   :  { %s7_s8 = smov 3  ;;  %vm9_vm0 = vcmask 523264   ;;  %s34_s9 = smov 64   ;;  %vm16_vm1 = vcmask 1048064   ;;  %s54_s0 = inlined_call_operand.vmem [shape: f32[4,64], index: 0, kind: input, shape index: {}]   ;;  %s55_s1 = inlined_call_operand.vmem [shape: f32[1,256], index: 1, kind: output, shape index: {}]  }
   0x1   :  { %v5_v0 = vld [vmem:[%s54_s0] sm:$0xf]  ;;  %s12_s0 = smov 3 }
   0x2   :  { %6 = vst [vmem:[#allocation1] sm:$0xf] %v5_v0 }
   0x9   :  { %v13_v1 = vld [vmem:[#allocation1 + $0x1] ss:$2 sm:%s12_s0]   ;;  %v8_v2 = vld [vmem:[#allocation1] ss:$2 sm:%s7_s8]  }
   0xa   :  { %14 = vrot.lane.b32.xlu0 %v13_v1, %s34_s9  ;;  %10 = vst.msk [vmem:[#allocation0] ss:$8 sm:$0x3] %vm9_vm0, %v8_v2  }
  0x7c   :  { %v15_v3 = vpop.permute.xlu0 %14  }
  0x7d   :  { %17 = vst.msk [vmem:[#allocation0] ss:$8 sm:$0x3] %vm16_vm1, %v15_v3  }
  0x84   :  { %v22_v4 = vld [vmem:[#allocation0] sm:$0x1]  ;;  %v27_v5 = vld [vmem:[#allocation0 + $0x8] sm:$0x1] }
  0x85   :  { %25 = vst [vmem:[%s55_s1] sm:$0x1] %v22_v4  ;;  %32 = vst [vmem:[%s55_s1 + $0x1] sm:$0x1] %v27_v5 }

// kernel: tile.19
= control target key start
LH: loop header
LB: loop body
LE: loop exit
PB: predicated region body
PF: predicated region fallthrough
CT: control target
= control target key end

     0   :  { %s22_s0 = inlined_call_operand.vmem [shape: f32[128], index: 0, kind: input, shape index: {}]   ;;  %s23_s1 = inlined_call_operand.vmem [shape: f32[4,128], index: 1, kind: output, shape index: {}]  }
   0x1   :  { %v4_v0 = vld [vmem:[%s22_s0] ss:$0 sm:$0xff] }
   0x2   :  { %5 = vst [vmem:[%s23_s1] sm:$0xf] %v4_v0 }

// kernel: _lambda_.1
= control target key start
LH: loop header
LB: loop body
LE: loop exit
PB: predicated region body
PF: predicated region fallthrough
CT: control target
= control target key end

     0   :  { %s3475_s0 = inlined_call_operand.vmem [shape: bf16[32,16], index: 0, kind: input, shape index: {}]   ;;  %s3476_s1 = inlined_call_operand.vmem [shape: bf16[16,256], index: 1, kind: input, shape index: {}]   ;;  %s3477_s2 = inlined_call_operand.vmem [shape: f32[1,256], index: 2, kind: input, shape index: {}]   ;;  %s3478_s3 = inlined_call_operand.vmem [shape: bf16[256,128], index: 3, kind: input, shape index: {}]   ;;  %s3479_s4 = inlined_call_operand.vmem [shape: f32[1,128], index: 4, kind: input, shape index: {}]   ;;  %s3480_s5 = inlined_call_operand.vmem [shape: f32[1,128], index: 5, kind: input, shape index: {}, may-alias: {5,13}]   ;;  %s3481_s6 = inlined_call_operand.vmem [shape: f32[1,128], index: 6, kind: input, shape index: {}, may-alias: {6,14}]   ;;  %s3482_s7 = inlined_call_operand.hbm [shape: bf16[512,256], index: 7, kind: input, shape index: {}]   ;;  %s3483_s8 = inlined_call_operand.vmem [shape: f32[1,256], index: 8, kind: input, shape index: {}]   ;;  %s3484_s9 = inlined_call_operand.vmem [shape: f32[1,256], index: 9, kind: input, shape index: {}]   ;;  %s3485_s10 = inlined_call_operand.vmem [shape: f32[1,256], index: 10, kind: input, shape index: {}]   ;;  %s3486_s11 = inlined_call_operand.vmem [shape: bf16[256,512], index: 11, kind: input, shape index: {}]   ;;  %s3487_s12 = inlined_call_operand.vmem [shape: f32[1,512], index: 12, kind: input, shape index: {}]   ;;  %s3488_s13 = inlined_call_operand.vmem [shape: f32[1,128], index: 13, kind: input, shape index: {}, may-alias: {5,13}]   ;;  %s3489_s14 = inlined_call_operand.vmem [shape: f32[1,128], index: 14, kind: input, shape index: {}, may-alias: {6,14}]   ;;  %s3490_s15 = inlined_call_operand.hbm [shape: bf16[128,512], index: 15, kind: input, shape index: {}]   ;;  %s3491_s16 = inlined_call_operand.vmem [shape: f32[1,512], index: 16, kind: input, shape index: {}]   ;;  %s3492_s17 = inlined_call_operand.vmem [shape: f32[1,128], index: 17, kind: input, shape index: {}]   ;;  %s3493_s18 = inlined_call_operand.vmem [shape: f32[1,128], index: 18, kind: input, shape index: {}]   ;;  %s3494_s19 = inlined_call_operand.vmem [shape: bf16[128,4], index: 19, kind: input, shape index: {}]   ;;  %s3495_s20 = inlined_call_operand.vmem [shape: f32[1,4], index: 20, kind: input, shape index: {}]   ;;  %s3496_s21 = inlined_call_operand.vmem [shape: f32[128,4], index: 21, kind: output, shape index: {}]  }
   0x1   :  { %3500 = sst [smem:[#allocation8_spill]] %s3475_s0 }
   0x2   :  { %3501 = sst [smem:[#allocation9_spill]] %s3476_s1 }
   0x3   :  { %3502 = sst [smem:[#allocation10_spill]] %s3477_s2 }
   0x4   :  { %3503 = sst [smem:[#allocation11_spill]] %s3478_s3 }
   0x5   :  { %3504 = sst [smem:[#allocation12_spill]] %s3479_s4 }
   0x6   :  { %3505 = sst [smem:[#allocation13_spill]] %s3480_s5 }
   0x7   :  { %26 = vsyncpa [#allocation3], 0 }
   0x8   :  { %27 = vsyncpa [#allocation5], 0  ;;  %s2874_s2 = smov [#allocation2]  }
   0x9   :  { %s47_s25 = sshll.u32 %s2874_s2, 4  ;;  %s48_s25 = int_to_ptr.vmem [resolvable:$true] %s47_s25 }
   0xa   :  { %s2838_s26 = scalar_lea.vmem %s48_s25, 8192  ;;  %p2843_p1 = scmp.lt.s32.totalorder %s48_s25, %s48_s25 }
   0xb   :  { %p2839_p0 = scmp.ne.s32.totalorder %s48_s25, %s2838_s26  ;;  %p2844_p2 = scmp.lt.s32.totalorder %s2838_s26, %s2838_s26 }
   0xd   :  { %p2845_p3 = por %p2844_p2, %p2843_p1 }
   0xf   :  { %p2846_p4 = pnand %p2845_p3, %p2839_p0 }
  0x11   :  { %2849 = shalt.err (!%p2846_p4)
}
  0x12   :  { %s2875_s27 = smov 128   ;;  %s2876_s3 = smov 8  }
  0x13   :  { %53 = dma.hbm_to_vmem [thread:$0]  %s3482_s7, 8192, %s48_s25, [#allocation3], %s2875_s27, %s2875_s27, %s2876_s3  }
  0x14   :  { %s2877_s0 = smov [#allocation4]  }
  0x15   :  { %s73_s4 = sshll.u32 %s2877_s0, 4  ;;  %s74_s4 = int_to_ptr.vmem [resolvable:$true] %s73_s4 }
  0x16   :  { %s2858_s30 = scalar_lea.vmem %s74_s4, 4096  ;;  %p2863_p6 = scmp.lt.s32.totalorder %s74_s4, %s74_s4 }
  0x17   :  { %p2859_p5 = scmp.ne.s32.totalorder %s74_s4, %s2858_s30  ;;  %p2864_p7 = scmp.lt.s32.totalorder %s2858_s30, %s2858_s30 }
  0x19   :  { %p2865_p8 = por %p2864_p7, %p2863_p6 }
  0x1b   :  { %p2866_p9 = pnand %p2865_p8, %p2859_p5 }
  0x1d   :  { %2869 = shalt.err (!%p2866_p9)
}
  0x1e   :  { %s2878_s5 = smov 256   ;;  %s2879_s22 = smov 16  }
  0x1f   :  { %79 = dma.hbm_to_vmem [thread:$0]  %s3490_s15, 4096, %s74_s4, [#allocation5], %s2878_s5, %s2878_s5, %s2879_s22  }
  0x20   :  { %2870 = dma.done.wait [#allocation3], 8192  }
  0x21   :  { %2871 = vsyncadd [#allocation3], 4294959104 }
  0x22   :  { %2872 = dma.done.wait [#allocation5], 4096  }
  0x23   :  { %2873 = vsyncadd [#allocation5], 4294963200  ;;  %v2880_v0 = vmov 0   ;;  %s3506_s2 = sld [smem:[#allocation9_spill]]  ;;  %vm135_vm0 = vcmask 130048   ;;  %v105_v21 = vlaneseq  ;;  %vm2217_vm1 = vcmask 31744  }
  0x24   :  { %174 = vmatprep.mubr.bf16.mxu1 %v2880_v0  ;;  %s3507_s28 = sld [smem:[#allocation8_spill]]  ;;  %v2540_v56 = vld [vmem:[#allocation2 + $0x74] ss:$8 sps:$4 sm:$0xff]   ;;  %v2542_v58 = vld [vmem:[#allocation2 + $0x170] ss:$8 sps:$4 sm:$0xff]  }
  0x25   :  { %s3508_s0 = sld [smem:[#allocation11_spill]]  ;;  %v3062_v22 = vshrl.u32 %v105_v21, 7  ;;  %v2544_v57 = vld [vmem:[#allocation2 + $0x174] ss:$8 sps:$4 sm:$0xff]   ;;  %v2545_v59 = vld [vmem:[#allocation2 + $0x70] ss:$8 sps:$4 sm:$0xff]   ;;  %848 = vmatprep.subr.bf16.mxu0 %v2540_v56 }
  0x26   :  { %849 = vmatpush1.bf16.msra.mxu0 %v2545_v59  ;;  %v2546_v60 = vld [vmem:[#allocation2 + $0x64] ss:$8 sps:$4 sm:$0xff]   ;;  %v2548_v62 = vld [vmem:[#allocation2 + $0x160] ss:$8 sps:$4 sm:$0xff]   ;;  %s3510_s23 = sld [smem:[#allocation12_spill]] }
  0x27   :  { %v3065_v23 = vsub.s32 1, %v3062_v22  ;;  %v3068_v24 = vsub.s32 0, %v3062_v22  ;;  %v2550_v61 = vld [vmem:[#allocation2 + $0x164] ss:$8 sps:$4 sm:$0xff]   ;;  %v2551_v63 = vld [vmem:[#allocation2 + $0x60] ss:$8 sps:$4 sm:$0xff]   ;;  %850 = vmatprep.subr.bf16.mxu0 %v2546_v60 }
  0x28   :  { %v2582_v21 = vld [vmem:[#allocation2 + $0x4] ss:$8 sps:$4 sm:$0xff]   ;;  %v2635_v59 = vld [vmem:[#allocation2 + $0x80] ss:$8 sps:$4 sm:$0xff]   ;;  %s3511_s24 = sld [smem:[#allocation13_spill]] }
  0x29   :  { %v2519_v1 = vld [vmem:[%s3506_s2 + $0x4] ss:$8 sps:$4 sm:$0xff]   ;;  %v2521_v2 = vld [vmem:[%s3506_s2] ss:$8 sps:$4 sm:$0xff]  }
  0x2a   :  { %156 = vmatprep.subr.bf16.mxu1 %v2519_v1  ;;  %v2522_v3 = vld [vmem:[%s3507_s28] sm:$0xff]   ;;  %v2523_v9 = vld [vmem:[%s3507_s28 + $0x8] sm:$0xff]   ;;  %s3509_s28 = sld [smem:[#allocation10_spill]]  ;;  %851 = vmatpush1.bf16.msra.mxu0 %v2551_v63  ;;  %v2552_v1 = vld [vmem:[#allocation2 + $0x54] ss:$8 sps:$4 sm:$0xff]  }
  0x2b   :  { %157 = vmatpush1.bf16.msra.mxu1 %v2521_v2  ;;  %v2524_v4 = vld [vmem:[%s3508_s0 + $0x78] sm:$0xff]   ;;  %v2526_v6 = vld [vmem:[%s3508_s0 + $0x70] sm:$0xff]   ;;  %v2528_v8 = vld [vmem:[%s3508_s0 + $0x68] sm:$0xff]   ;;  %852 = vmatprep.subr.bf16.mxu0 %v2552_v1 }
  0x2c   :  { %v2525_v5 = vld [vmem:[%s3508_s0 + $0x38] sm:$0xff]   ;;  %2435 = vmatprep.subr.bf16.mxu1 %v2524_v4  ;;  %v2527_v7 = vld [vmem:[%s3508_s0 + $0x30] sm:$0xff]   ;;  %v2529_v10 = vld [vmem:[%s3508_s0 + $0x28] sm:$0xff]  }
  0x2d   :  { %v2530_v11 = vld [vmem:[%s3508_s0 + $0x60] sm:$0xff]   ;;  %v2532_v13 = vld [vmem:[%s3508_s0 + $0x58] sm:$0xff]   ;;  %v2534_v15 = vld [vmem:[%s3508_s0 + $0x50] sm:$0xff]  }
  0x2e   :  { %2244 = vmatmul.mubr.msk.bf16.vlgmr.msra.gmra.mxu1 %vm135_vm0, %v2522_v3  ;;  %v2531_v12 = vld [vmem:[%s3508_s0 + $0x20] sm:$0xff]   ;;  %v2533_v14 = vld [vmem:[%s3508_s0 + $0x18] sm:$0xff]   ;;  %v2535_v16 = vld [vmem:[%s3508_s0 + $0x10] sm:$0xff]  }
  0x2f   :  { %184 = vmatprep.mubr.bf16.mxu1 %v2880_v0  ;;  %2436 = vmatpush3.bf16.msra.mxu1 %v2525_v5  ;;  %v2536_v17 = vld [vmem:[%s3508_s0 + $0x48] sm:$0xff]   ;;  %v2538_v19 = vld [vmem:[%s3508_s0 + $0x40] sm:$0xff]   ;;  %v2556_v2 = vld [vmem:[#allocation2 + $0x154] ss:$8 sps:$4 sm:$0xff]  }
  0x30   :  { %2437 = vmatprep.subr.bf16.mxu1 %v2526_v6  ;;  %v2537_v18 = vld [vmem:[%s3508_s0 + $0x8] sm:$0xff]   ;;  %v2539_v20 = vld [vmem:[%s3508_s0] sm:$0xff]   ;;  %v2554_v3 = vld [vmem:[#allocation2 + $0x150] ss:$8 sps:$4 sm:$0xff]  }
  0x31   :  { %v103_v25 = vld [vmem:[%s3509_s28] sm:$0x3]  ;;  %v2557_v4 = vld [vmem:[#allocation2 + $0x50] ss:$8 sps:$4 sm:$0xff]   ;;  %v2558_v5 = vld [vmem:[#allocation2 + $0x44] ss:$8 sps:$4 sm:$0xff]  }
  0x32   :  { %v112_v27 = vrot.slane %v103_v25, %v3065_v23  ;;  %v108_v28 = vrot.slane %v103_v25, %v3068_v24  ;;  %853 = vmatpush1.bf16.msra.mxu0 %v2557_v4  ;;  %v2562_v6 = vld [vmem:[#allocation2 + $0x144] ss:$8 sps:$4 sm:$0xff]   ;;  %v2246_v4 = vld [vmem:[%s3510_s23] ss:$0 sm:$0xff] }
  0x33   :  { %2438 = vmatpush3.bf16.msra.mxu1 %v2527_v7  ;;  %v2560_v7 = vld [vmem:[#allocation2 + $0x140] ss:$8 sps:$4 sm:$0xff]   ;;  %854 = vmatprep.subr.bf16.mxu0 %v2558_v5  ;;  %v2586_v25 = vld [vmem:[#allocation2 + $0x104] ss:$8 sps:$4 sm:$0xff]  }
  0x34   :  { %2439 = vmatprep.subr.bf16.mxu1 %v2528_v8  ;;  %v2563_v8 = vld [vmem:[#allocation2 + $0x40] ss:$8 sps:$4 sm:$0xff]   ;;  %v2630_v56 = vld [vmem:[#allocation2 + $0x84] ss:$8 sps:$4 sm:$0xff]  }
  0x36   :  { %2245 = vmatmul.mubr.msk.bf16.gmra.mxu1 %vm135_vm0, %v2523_v9  ;;  %855 = vmatpush1.bf16.msra.mxu0 %v2563_v8  ;;  %v2564_v9 = vld [vmem:[#allocation2 + $0x34] ss:$8 sps:$4 sm:$0xff]  }
  0x37   :  { %2440 = vmatpush3.bf16.msra.mxu1 %v2529_v10  ;;  %v2566_v10 = vld [vmem:[#allocation2 + $0x130] ss:$8 sps:$4 sm:$0xff]   ;;  %856 = vmatprep.subr.bf16.mxu0 %v2564_v9 }
  0x38   :  { %2441 = vmatprep.subr.bf16.mxu1 %v2530_v11  ;;  %v2568_v11 = vld [vmem:[#allocation2 + $0x134] ss:$8 sps:$4 sm:$0xff]  }
  0x3b   :  { %2442 = vmatpush3.bf16.msra.mxu1 %v2531_v12  ;;  %v2569_v12 = vld [vmem:[#allocation2 + $0x30] ss:$8 sps:$4 sm:$0xff]  }
  0x3c   :  { %2443 = vmatprep.subr.bf16.mxu1 %v2532_v13  ;;  %v2570_v13 = vld [vmem:[#allocation2 + $0x24] ss:$8 sps:$4 sm:$0xff]   ;;  %857 = vmatpush1.bf16.msra.mxu0 %v2569_v12 }
  0x3d   :  { %858 = vmatprep.subr.bf16.mxu0 %v2570_v13 }
  0x3f   :  { %2444 = vmatpush3.bf16.msra.mxu1 %v2533_v14  ;;  %v2574_v14 = vld [vmem:[#allocation2 + $0x124] ss:$8 sps:$4 sm:$0xff]  }
  0x40   :  { %2445 = vmatprep.subr.bf16.mxu1 %v2534_v15  ;;  %v2572_v15 = vld [vmem:[#allocation2 + $0x120] ss:$8 sps:$4 sm:$0xff]  }
  0x43   :  { %2446 = vmatpush3.bf16.msra.mxu1 %v2535_v16  ;;  %v2575_v16 = vld [vmem:[#allocation2 + $0x20] ss:$8 sps:$4 sm:$0xff]  }
  0x44   :  { %2447 = vmatprep.subr.bf16.mxu1 %v2536_v17  ;;  %v2576_v17 = vld [vmem:[#allocation2 + $0x14] ss:$8 sps:$4 sm:$0xff]   ;;  %859 = vmatpush1.bf16.msra.mxu0 %v2575_v16 }
  0x45   :  { %860 = vmatprep.subr.bf16.mxu0 %v2576_v17 }
  0x47   :  { %2448 = vmatpush3.bf16.msra.mxu1 %v2537_v18  ;;  %v2580_v18 = vld [vmem:[#allocation2 + $0x114] ss:$8 sps:$4 sm:$0xff]  }
  0x48   :  { %2449 = vmatprep.subr.bf16.mxu1 %v2538_v19  ;;  %v2578_v19 = vld [vmem:[#allocation2 + $0x110] ss:$8 sps:$4 sm:$0xff]  }
  0x4b   :  { %2450 = vmatpush3.bf16.msra.mxu1 %v2539_v20  ;;  %v2581_v20 = vld [vmem:[#allocation2 + $0x10] ss:$8 sps:$4 sm:$0xff]  }
  0x4c   :  { %889 = vmatprep.subr.bf16.mxu1 %v2544_v57  ;;  %861 = vmatpush1.bf16.msra.mxu0 %v2581_v20  ;;  %v2634_v57 = vld [vmem:[#allocation2 + $0x184] ss:$8 sps:$4 sm:$0xff]  }
  0x4d   :  { %862 = vmatprep.subr.bf16.mxu0 %v2582_v21 }
  0xee   :  { %v176_v26 = vpop.f32.mrf.mxu1 }
  0xef   :  { %v177_v33 = vadd.f32 %v176_v26, %v108_v28  ;;  %v2584_v26 = vld [vmem:[#allocation2 + $0x100] ss:$8 sps:$4 sm:$0xff]  }
  0xf0   :  { %v178_v29 = vpop.f32.mrf.mxu1 }
  0xf1   :  { %v179_v31 = vadd.f32 %v178_v29, %v112_v27  ;;  %v195_v40 = vmax.f32 %v177_v33, 0.0  ;;  %v2592_v29 = vld [vmem:[#allocation2 + $0x1f4] ss:$8 sps:$4 sm:$0xff]   ;;  %v2598_v33 = vld [vmem:[#allocation2 + $0x1e4] ss:$8 sps:$4 sm:$0xff]  }
  0xf2   :  { %v180_v30 = vpop.f32.mrf.mxu1 }
  0xf3   :  { %v181_v32 = vadd.f32 %v180_v30, %v108_v28  ;;  %v196_v38 = vmax.f32 %v179_v31, 0.0  ;;  %v2590_v30 = vld [vmem:[#allocation2 + $0x1f0] ss:$8 sps:$4 sm:$0xff]  }
  0xf4   :  { %v182_v34 = vpop.f32.mrf.mxu1  ;;  %v2593_v31 = vld [vmem:[#allocation2 + $0xf0] ss:$8 sps:$4 sm:$0xff]  }
  0xf5   :  { %v183_v35 = vadd.f32 %v182_v34, %v112_v27  ;;  %v197_v36 = vmax.f32 %v181_v32, 0.0  ;;  %v2594_v32 = vld [vmem:[#allocation2 + $0xe4] ss:$8 sps:$4 sm:$0xff]   ;;  %v2596_v34 = vld [vmem:[#allocation2 + $0x1e0] ss:$8 sps:$4 sm:$0xff]  }
  0xf6   :  { %v186_v37 = vpop.f32.mrf.mxu1 }
  0xf7   :  { %v198_v39 = vmax.f32 %v183_v35, 0.0  ;;  %v203_v43 = vpack.c.bf16 %v197_v36, %v195_v40  ;;  %v187_v47 = vadd.f32 %v186_v37, %v108_v28  ;;  %v2599_v35 = vld [vmem:[#allocation2 + $0xe0] ss:$8 sps:$4 sm:$0xff]   ;;  %v2600_v36 = vld [vmem:[#allocation2 + $0xd4] ss:$8 sps:$4 sm:$0xff]  }
  0xf8   :  { %v188_v41 = vpop.f32.mrf.mxu1  ;;  %v2604_v37 = vld [vmem:[#allocation2 + $0x1d4] ss:$8 sps:$4 sm:$0xff]   ;;  %v2606_v40 = vld [vmem:[#allocation2 + $0xc4] ss:$8 sps:$4 sm:$0xff]  }
  0xf9   :  { %v204_v42 = vpack.c.bf16 %v198_v39, %v196_v38  ;;  %v189_v45 = vadd.f32 %v188_v41, %v112_v27  ;;  %v199_v53 = vmax.f32 %v187_v47, 0.0  ;;  %v2602_v38 = vld [vmem:[#allocation2 + $0x1d0] ss:$8 sps:$4 sm:$0xff]   ;;  %v2610_v41 = vld [vmem:[#allocation2 + $0x1c4] ss:$8 sps:$4 sm:$0xff]  }
  0xfa   :  { %v190_v44 = vpop.f32.mrf.mxu1  ;;  %v2605_v39 = vld [vmem:[#allocation2 + $0xd0] ss:$8 sps:$4 sm:$0xff]  }
  0xfb   :  { %v191_v46 = vadd.f32 %v190_v44, %v108_v28  ;;  %374 = vmatprep.mubr.bf16.mxu1 %v204_v42  ;;  %v200_v51 = vmax.f32 %v189_v45, 0.0  ;;  %v2588_v28 = vld [vmem:[#allocation2 + $0xf4] ss:$8 sps:$4 sm:$0xff]   ;;  %v2608_v42 = vld [vmem:[#allocation2 + $0x1c0] ss:$8 sps:$4 sm:$0xff]  }
  0xfc   :  { %v192_v48 = vpop.f32.mrf.mxu1  ;;  %375 = vmatmul.mubr.bf16.vlgmr.msra.gmra.mxu1 %v203_v43  ;;  %v2611_v43 = vld [vmem:[#allocation2 + $0xc0] ss:$8 sps:$4 sm:$0xff]   ;;  %v2612_v44 = vld [vmem:[#allocation2 + $0xb4] ss:$8 sps:$4 sm:$0xff]   ;;  %v2617_v47 = vld [vmem:[#allocation2 + $0xb0] ss:$8 sps:$4 sm:$0xff]  }
  0xfd   :  { %v193_v49 = vadd.f32 %v192_v48, %v112_v27  ;;  %v201_v50 = vmax.f32 %v191_v46, 0.0  ;;  %890 = vmatpush1.bf16.msra.mxu1 %v2542_v58  ;;  %v2587_v27 = vld [vmem:[#allocation2] ss:$8 sps:$4 sm:$0xff]   ;;  %v2616_v45 = vld [vmem:[#allocation2 + $0x1b4] ss:$8 sps:$4 sm:$0xff]  }
  0xfe   :  { %891 = vmatprep.subr.bf16.mxu1 %v2550_v61  ;;  %863 = vmatpush1.bf16.msra.mxu0 %v2587_v27  ;;  %v2614_v46 = vld [vmem:[#allocation2 + $0x1b0] ss:$8 sps:$4 sm:$0xff]   ;;  %v2618_v48 = vld [vmem:[#allocation2 + $0xa4] ss:$8 sps:$4 sm:$0xff]   ;;  %v2632_v58 = vld [vmem:[#allocation2 + $0x180] ss:$8 sps:$4 sm:$0xff]  }
  0xff   :  { %v202_v52 = vmax.f32 %v193_v49, 0.0  ;;  %v205_v55 = vpack.c.bf16 %v201_v50, %v199_v53  ;;  %864 = vmatprep.subr.bf16.mxu0 %v2588_v28  ;;  %v2622_v49 = vld [vmem:[#allocation2 + $0x1a4] ss:$8 sps:$4 sm:$0xff]   ;;  %v2620_v50 = vld [vmem:[#allocation2 + $0x1a0] ss:$8 sps:$4 sm:$0xff]  }
 0x100   :  { %v2628_v53 = vld [vmem:[#allocation2 + $0x194] ss:$8 sps:$4 sm:$0xff]  }
 0x101   :  { %v206_v54 = vpack.c.bf16 %v202_v52, %v200_v51  ;;  %892 = vmatpush1.bf16.msra.mxu1 %v2548_v62  ;;  %v2623_v51 = vld [vmem:[#allocation2 + $0xa0] ss:$8 sps:$4 sm:$0xff]   ;;  %v2624_v52 = vld [vmem:[#allocation2 + $0x94] ss:$8 sps:$4 sm:$0xff]  }
 0x102   :  { %893 = vmatprep.subr.bf16.mxu1 %v2556_v2  ;;  %865 = vmatpush2.bf16.msra.mxu0 %v2593_v31 }
 0x103   :  { %382 = vmatprep.mubr.bf16.mxu1 %v206_v54  ;;  %866 = vmatprep.subr.bf16.mxu0 %v2594_v32  ;;  %v2626_v54 = vld [vmem:[#allocation2 + $0x190] ss:$8 sps:$4 sm:$0xff]  }
 0x104   :  { %383 = vmatmul.mubr.bf16.gmra.mxu1 %v205_v55  ;;  %v2629_v55 = vld [vmem:[#allocation2 + $0x90] ss:$8 sps:$4 sm:$0xff]  }
 0x105   :  { %894 = vmatpush1.bf16.msra.mxu1 %v2554_v3 }
 0x106   :  { %895 = vmatprep.subr.bf16.mxu1 %v2562_v6  ;;  %867 = vmatpush2.bf16.msra.mxu0 %v2599_v35 }
 0x107   :  { %868 = vmatprep.subr.bf16.mxu0 %v2600_v36 }
 0x109   :  { %896 = vmatpush1.bf16.msra.mxu1 %v2560_v7 }
 0x10a   :  { %897 = vmatprep.subr.bf16.mxu1 %v2568_v11  ;;  %869 = vmatpush2.bf16.msra.mxu0 %v2605_v39 }
 0x10b   :  { %870 = vmatprep.subr.bf16.mxu0 %v2606_v40 }
 0x10d   :  { %898 = vmatpush1.bf16.msra.mxu1 %v2566_v10 }
 0x10e   :  { %899 = vmatprep.subr.bf16.mxu1 %v2574_v14  ;;  %871 = vmatpush2.bf16.msra.mxu0 %v2611_v43 }
 0x10f   :  { %872 = vmatprep.subr.bf16.mxu0 %v2612_v44 }
 0x111   :  { %900 = vmatpush1.bf16.msra.mxu1 %v2572_v15 }
 0x112   :  { %901 = vmatprep.subr.bf16.mxu1 %v2580_v18  ;;  %873 = vmatpush2.bf16.msra.mxu0 %v2617_v47 }
 0x113   :  { %874 = vmatprep.subr.bf16.mxu0 %v2618_v48 }
 0x115   :  { %902 = vmatpush1.bf16.msra.mxu1 %v2578_v19 }
 0x116   :  { %903 = vmatprep.subr.bf16.mxu1 %v2586_v25  ;;  %875 = vmatpush2.bf16.msra.mxu0 %v2623_v51 }
 0x117   :  { %876 = vmatprep.subr.bf16.mxu0 %v2624_v52 }
 0x119   :  { %904 = vmatpush1.bf16.msra.mxu1 %v2584_v26 }
 0x11a   :  { %905 = vmatprep.subr.bf16.mxu1 %v2592_v29  ;;  %877 = vmatpush2.bf16.msra.mxu0 %v2629_v55 }
 0x11b   :  { %878 = vmatprep.subr.bf16.mxu0 %v2630_v56 }
 0x11d   :  { %906 = vmatpush2.bf16.msra.mxu1 %v2590_v30 }
 0x11e   :  { %907 = vmatprep.subr.bf16.mxu1 %v2598_v33  ;;  %879 = vmatpush2.bf16.msra.mxu0 %v2635_v59 }
 0x121   :  { %908 = vmatpush2.bf16.msra.mxu1 %v2596_v34 }
 0x122   :  { %909 = vmatprep.subr.bf16.mxu1 %v2604_v37 }
 0x125   :  { %910 = vmatpush2.bf16.msra.mxu1 %v2602_v38 }
 0x126   :  { %911 = vmatprep.subr.bf16.mxu1 %v2610_v41 }
 0x129   :  { %912 = vmatpush2.bf16.msra.mxu1 %v2608_v42 }
 0x12a   :  { %913 = vmatprep.subr.bf16.mxu1 %v2616_v45 }
 0x12d   :  { %914 = vmatpush2.bf16.msra.mxu1 %v2614_v46  ;;  %v391_v46 = vld [vmem:[%s3511_s24] sm:$0x1] }
 0x12e   :  { %915 = vmatprep.subr.bf16.mxu1 %v2622_v49 }
 0x131   :  { %916 = vmatpush2.bf16.msra.mxu1 %v2620_v50  ;;  %v2263_v50 = vld [vmem:[%s3481_s6] ss:$0 sm:$0xff] }
 0x132   :  { %917 = vmatprep.subr.bf16.mxu1 %v2628_v53 }
 0x135   :  { %918 = vmatpush2.bf16.msra.mxu1 %v2626_v54 }
 0x136   :  { %919 = vmatprep.subr.bf16.mxu1 %v2634_v57 }
 0x139   :  { %920 = vmatpush2.bf16.msra.mxu1 %v2632_v58 }
 0x1bc   :  { %v2451_v60 = vpop.f32.mrf.mxu1 }
 0x1be   :  { %v2452_v61 = vpop.f32.mrf.mxu1 }
 0x1bf   :  { %v2453_v3 = vadd.f32 %v2452_v61, %v2451_v60 }
 0x1c0   :  { %v2454_v62 = vpop.f32.mrf.mxu1 }
 0x1c1   :  { %v377_v9 = vadd.f32 %v2453_v3, %v2246_v4 }
 0x1c2   :  { %v2455_v63 = vpop.f32.mrf.mxu1 }
 0x1c3   :  { %v2456_v1 = vadd.f32 %v2455_v63, %v2454_v62 }
 0x1c4   :  { %v2457_v2 = vpop.f32.mrf.mxu1 }
 0x1c5   :  { %v380_v6 = vadd.f32 %v2456_v1, %v2246_v4 }
 0x1c6   :  { %v2458_v5 = vpop.f32.mrf.mxu1 }
 0x1c7   :  { %v2459_v7 = vadd.f32 %v2458_v5, %v2457_v2  ;;  %v393_v12 = vadd.f32 %v380_v6, %v377_v9  ;;  %v2641_v5 = vld [vmem:[%s3486_s11 + $0xec] ss:$16 sps:$4 sm:$0xff]  }
 0x1c8   :  { %v2460_v8 = vpop.f32.mrf.mxu1  ;;  %1464 = vmatprep.subr.bf16.mxu1 %v2641_v5  ;;  %v2731_v5 = vld [vmem:[%s3486_s11 + $0x10c] ss:$16 sps:$4 sm:$0xff]  }
 0x1c9   :  { %v385_v10 = vadd.f32 %v2459_v7, %v2246_v4  ;;  %v2639_v7 = vld [vmem:[%s3486_s11 + $0xe8] ss:$16 sps:$4 sm:$0xff]  }
 0x1ca   :  { %v2461_v11 = vpop.f32.mrf.mxu1 }
 0x1cb   :  { %v2462_v13 = vadd.f32 %v2461_v11, %v2460_v8  ;;  %v394_v14 = vadd.f32 %v393_v12, %v385_v10  ;;  %v2644_v8 = vld [vmem:[%s3486_s11 + $0xc4] ss:$16 sps:$4 sm:$0xff]   ;;  %v2645_v11 = vld [vmem:[%s3486_s11 + $0xc8] ss:$16 sps:$4 sm:$0xff]  }
 0x1cc   :  { %v2650_v12 = vld [vmem:[%s3486_s11 + $0xa4] ss:$16 sps:$4 sm:$0xff]  }
 0x1cd   :  { %v388_v15 = vadd.f32 %v2462_v13, %v2246_v4  ;;  %v2638_v4 = vld [vmem:[%s3486_s11 + $0xe4] ss:$16 sps:$4 sm:$0xff]   ;;  %v2653_v13 = vld [vmem:[%s3486_s11 + $0xac] ss:$16 sps:$4 sm:$0xff]  }
 0x1ce   :  { %1423 = vmatprep.subr.bf16.mxu0 %v2638_v4  ;;  %v2728_v4 = vld [vmem:[%s3486_s11 + $0x104] ss:$16 sps:$4 sm:$0xff]  }
 0x1cf   :  { %v395_v16 = vadd.f32 %v394_v14, %v388_v15  ;;  %v2648_v14 = vld [vmem:[%s3486_s11 + $0xa0] ss:$16 sps:$4 sm:$0xff]  }
 0x1d1   :  { %v396_v17 = vrot.slane %v395_v16, 4 }
 0x1d3   :  { %v397_v18 = vadd.f32 %v396_v17, %v395_v16  ;;  %v2656_v16 = vld [vmem:[%s3486_s11 + $0x84] ss:$16 sps:$4 sm:$0xff]   ;;  %v2659_v17 = vld [vmem:[%s3486_s11 + $0x8c] ss:$16 sps:$4 sm:$0xff]  }
 0x1d5   :  { %v398_v19 = vrot.slane %v397_v18, 2 }
 0x1d7   :  { %v399_v20 = vadd.f32 %v398_v19, %v397_v18  ;;  %v2654_v18 = vld [vmem:[%s3486_s11 + $0x80] ss:$16 sps:$4 sm:$0xff]   ;;  %v2657_v19 = vld [vmem:[%s3486_s11 + $0x88] ss:$16 sps:$4 sm:$0xff]  }
 0x1d9   :  { %v400_v21 = vrot.slane %v399_v20, 1 }
 0x1db   :  { %v401_v25 = vadd.f32 %v400_v21, %v399_v20  ;;  %v2662_v20 = vld [vmem:[%s3486_s11 + $0x64] ss:$16 sps:$4 sm:$0xff]   ;;  %v2665_v21 = vld [vmem:[%s3486_s11 + $0x6c] ss:$16 sps:$4 sm:$0xff]  }
 0x1dd   :  { %v402_v26 = vmul.f32 0.03125, %v401_v25  ;;  %v2660_v25 = vld [vmem:[%s3486_s11 + $0x60] ss:$16 sps:$4 sm:$0xff]  }
 0x1df   :  { %v403_v27 = vsub.f32 %v377_v9, %v402_v26  ;;  %v404_v28 = vsub.f32 %v380_v6, %v402_v26  ;;  %v405_v29 = vsub.f32 %v385_v10, %v402_v26  ;;  %v406_v30 = vsub.f32 %v388_v15, %v402_v26  ;;  %v2636_v6 = vld [vmem:[%s3486_s11 + $0xe0] ss:$16 sps:$4 sm:$0xff]   ;;  %v2647_v9 = vld [vmem:[%s3486_s11 + $0xcc] ss:$16 sps:$4 sm:$0xff]   ;;  %v2651_v15 = vld [vmem:[%s3486_s11 + $0xa8] ss:$16 sps:$4 sm:$0xff]  }
 0x1e0   :  { %v2642_v10 = vld [vmem:[%s3486_s11 + $0xc0] ss:$16 sps:$4 sm:$0xff]   ;;  %v2663_v26 = vld [vmem:[%s3486_s11 + $0x68] ss:$16 sps:$4 sm:$0xff]  }
 0x1e1   :  { %v407_v31 = vmul.f32 %v403_v27, %v403_v27  ;;  %v408_v32 = vmul.f32 %v404_v28, %v404_v28  ;;  %v409_v33 = vmul.f32 %v405_v29, %v405_v29  ;;  %v410_v35 = vmul.f32 %v406_v30, %v406_v30 }
 0x1e3   :  { %v411_v34 = vadd.f32 %v408_v32, %v407_v31  ;;  %v2674_v31 = vld [vmem:[%s3486_s11 + $0x24] ss:$16 sps:$4 sm:$0xff]   ;;  %v2677_v32 = vld [vmem:[%s3486_s11 + $0x2c] ss:$16 sps:$4 sm:$0xff]  }
 0x1e5   :  { %v412_v36 = vadd.f32 %v411_v34, %v409_v33  ;;  %v2672_v33 = vld [vmem:[%s3486_s11 + $0x20] ss:$16 sps:$4 sm:$0xff]   ;;  %v2675_v34 = vld [vmem:[%s3486_s11 + $0x28] ss:$16 sps:$4 sm:$0xff]  }
 0x1e7   :  { %v413_v37 = vadd.f32 %v412_v36, %v410_v35  ;;  %v2680_v35 = vld [vmem:[%s3486_s11 + $0x4] ss:$16 sps:$4 sm:$0xff]   ;;  %v2683_v36 = vld [vmem:[%s3486_s11 + $0xc] ss:$16 sps:$4 sm:$0xff]  }
 0x1e9   :  { %v414_v38 = vrot.slane %v413_v37, 4 }
 0x1eb   :  { %v415_v39 = vadd.f32 %v414_v38, %v413_v37  ;;  %v2678_v37 = vld [vmem:[%s3486_s11] ss:$16 sps:$4 sm:$0xff]   ;;  %v2681_v38 = vld [vmem:[%s3486_s11 + $0x8] ss:$16 sps:$4 sm:$0xff]  }
 0x1ed   :  { %v416_v40 = vrot.slane %v415_v39, 2 }
 0x1ef   :  { %v417_v41 = vadd.f32 %v416_v40, %v415_v39  ;;  %v2686_v39 = vld [vmem:[%s3486_s11 + $0x1e4] ss:$16 sps:$4 sm:$0xff]   ;;  %v2689_v40 = vld [vmem:[%s3486_s11 + $0x1ec] ss:$16 sps:$4 sm:$0xff]  }
 0x1f1   :  { %v418_v42 = vrot.slane %v417_v41, 1 }
 0x1f3   :  { %v419_v43 = vadd.f32 %v418_v42, %v417_v41  ;;  %v2684_v41 = vld [vmem:[%s3486_s11 + $0x1e0] ss:$16 sps:$4 sm:$0xff]   ;;  %v2687_v42 = vld [vmem:[%s3486_s11 + $0x1e8] ss:$16 sps:$4 sm:$0xff]  }
 0x1f5   :  { %v420_v44 = vmul.f32 0.03125, %v419_v43  ;;  %v2692_v43 = vld [vmem:[%s3486_s11 + $0x1c4] ss:$16 sps:$4 sm:$0xff]  }
 0x1f7   :  { %v421_v45 = vadd.f32 1e-05, %v420_v44  ;;  %v2695_v44 = vld [vmem:[%s3486_s11 + $0x1cc] ss:$16 sps:$4 sm:$0xff]  }
 0x1f9   :  { %2788 = vrsqrt.f32 %v421_v45  ;;  %v2690_v45 = vld [vmem:[%s3486_s11 + $0x1c0] ss:$16 sps:$4 sm:$0xff]  }
 0x206   :  { %v2789_v47 = vpop.eup %2788 }
 0x207   :  { %v423_v48 = vmul.f32 %v2789_v47, %v391_v46  ;;  %v2693_v46 = vld [vmem:[%s3486_s11 + $0x1c8] ss:$16 sps:$4 sm:$0xff]   ;;  %v2698_v47 = vld [vmem:[%s3486_s11 + $0x1a4] ss:$16 sps:$4 sm:$0xff]  }
 0x209   :  { %v428_v49 = vrot.slane %v423_v48, %v3068_v24  ;;  %v2701_v48 = vld [vmem:[%s3486_s11 + $0x1ac] ss:$16 sps:$4 sm:$0xff]  }
 0x20b   :  { %v431_v51 = vmul.f32 %v428_v49, %v404_v28  ;;  %v432_v52 = vmul.f32 %v428_v49, %v405_v29  ;;  %v433_v53 = vmul.f32 %v428_v49, %v406_v30  ;;  %v430_v54 = vmul.f32 %v428_v49, %v403_v27  ;;  %v2668_v27 = vld [vmem:[%s3486_s11 + $0x44] ss:$16 sps:$4 sm:$0xff]   ;;  %v2671_v28 = vld [vmem:[%s3486_s11 + $0x4c] ss:$16 sps:$4 sm:$0xff]   ;;  %v2666_v29 = vld [vmem:[%s3486_s11 + $0x40] ss:$16 sps:$4 sm:$0xff]  }
 0x20c   :  { %v2669_v30 = vld [vmem:[%s3486_s11 + $0x48] ss:$16 sps:$4 sm:$0xff]   ;;  %v2696_v49 = vld [vmem:[%s3486_s11 + $0x1a0] ss:$16 sps:$4 sm:$0xff]  }
 0x20d   :  { %v441_v55 = vadd.f32 %v2263_v50, %v431_v51  ;;  %v442_v56 = vadd.f32 %v2263_v50, %v432_v52  ;;  %v443_v57 = vadd.f32 %v2263_v50, %v433_v53  ;;  %v440_v58 = vadd.f32 %v2263_v50, %v430_v54  ;;  %v2699_v50 = vld [vmem:[%s3486_s11 + $0x1a8] ss:$16 sps:$4 sm:$0xff]   ;;  %v2704_v51 = vld [vmem:[%s3486_s11 + $0x184] ss:$16 sps:$4 sm:$0xff]   ;;  %v2707_v52 = vld [vmem:[%s3486_s11 + $0x18c] ss:$16 sps:$4 sm:$0xff]  }
 0x20e   :  { %v2702_v53 = vld [vmem:[%s3486_s11 + $0x180] ss:$16 sps:$4 sm:$0xff]   ;;  %v2705_v54 = vld [vmem:[%s3486_s11 + $0x188] ss:$16 sps:$4 sm:$0xff]  }
 0x20f   :  { %v445_v59 = vmax.f32 %v441_v55, 0.0  ;;  %v446_v60 = vmax.f32 %v442_v56, 0.0  ;;  %v447_v61 = vmax.f32 %v443_v57, 0.0  ;;  %v444_v62 = vmax.f32 %v440_v58, 0.0  ;;  %v2710_v55 = vld [vmem:[%s3486_s11 + $0x164] ss:$16 sps:$4 sm:$0xff]  }
 0x210   :  { %v2713_v56 = vld [vmem:[%s3486_s11 + $0x16c] ss:$16 sps:$4 sm:$0xff]   ;;  %v2708_v57 = vld [vmem:[%s3486_s11 + $0x160] ss:$16 sps:$4 sm:$0xff]   ;;  %v2711_v58 = vld [vmem:[%s3486_s11 + $0x168] ss:$16 sps:$4 sm:$0xff]  }
 0x211   :  { %v449_v63 = vpack.c.bf16 %v445_v59, %v445_v59  ;;  %v450_v1 = vpack.c.bf16 %v446_v60, %v446_v60  ;;  %v451_v2 = vpack.c.bf16 %v447_v61, %v447_v61  ;;  %v448_v3 = vpack.c.bf16 %v444_v62, %v444_v62  ;;  %v2716_v59 = vld [vmem:[%s3486_s11 + $0x144] ss:$16 sps:$4 sm:$0xff]   ;;  %v2719_v60 = vld [vmem:[%s3486_s11 + $0x14c] ss:$16 sps:$4 sm:$0xff]   ;;  %v2714_v61 = vld [vmem:[%s3486_s11 + $0x140] ss:$16 sps:$4 sm:$0xff]  }
 0x212   :  { %v2717_v62 = vld [vmem:[%s3486_s11 + $0x148] ss:$16 sps:$4 sm:$0xff]  }
 0x213   :  { %880 = vmatprep.mubr.bf16.mxu0 %v449_v63  ;;  %921 = vmatprep.mubr.bf16.mxu1 %v451_v2  ;;  %v2722_v63 = vld [vmem:[%s3486_s11 + $0x124] ss:$16 sps:$4 sm:$0xff]   ;;  %v2720_v2 = vld [vmem:[%s3486_s11 + $0x120] ss:$16 sps:$4 sm:$0xff]  }
 0x214   :  { %881 = vmatmul.mubr.bf16.vlgmr.msra.gmra.mxu0 %v448_v3  ;;  %922 = vmatmul.mubr.bf16.vlgmr.msra.gmra.mxu1 %v450_v1  ;;  %v2725_v1 = vld [vmem:[%s3486_s11 + $0x12c] ss:$16 sps:$4 sm:$0xff]   ;;  %v2723_v3 = vld [vmem:[%s3486_s11 + $0x128] ss:$16 sps:$4 sm:$0xff]  }
 0x215   :  { %1424 = vmatpush1.bf16.msra.mxu0 %v2636_v6  ;;  %1465 = vmatpush1.bf16.msra.mxu1 %v2639_v7  ;;  %v2726_v6 = vld [vmem:[%s3486_s11 + $0x100] ss:$16 sps:$4 sm:$0xff]   ;;  %v2729_v7 = vld [vmem:[%s3486_s11 + $0x108] ss:$16 sps:$4 sm:$0xff]  }
 0x216   :  { %1425 = vmatprep.subr.bf16.mxu0 %v2644_v8  ;;  %1466 = vmatprep.subr.bf16.mxu1 %v2647_v9  ;;  %v516_v8 = vld [vmem:[%s3483_s8] sm:$0x3] }
 0x217   :  { %v521_v9 = vrot.slane %v516_v8, %v3068_v24 }
 0x219   :  { %1426 = vmatpush1.bf16.msra.mxu0 %v2642_v10  ;;  %1467 = vmatpush1.bf16.msra.mxu1 %v2645_v11  ;;  %v525_v10 = vrot.slane %v516_v8, %v3065_v23 }
 0x21a   :  { %1427 = vmatprep.subr.bf16.mxu0 %v2650_v12  ;;  %1468 = vmatprep.subr.bf16.mxu1 %v2653_v13 }
 0x21d   :  { %1428 = vmatpush1.bf16.msra.mxu0 %v2648_v14  ;;  %1469 = vmatpush1.bf16.msra.mxu1 %v2651_v15 }
 0x21e   :  { %1429 = vmatprep.subr.bf16.mxu0 %v2656_v16  ;;  %1470 = vmatprep.subr.bf16.mxu1 %v2659_v17 }
 0x221   :  { %1430 = vmatpush1.bf16.msra.mxu0 %v2654_v18  ;;  %1471 = vmatpush1.bf16.msra.mxu1 %v2657_v19 }
 0x222   :  { %1431 = vmatprep.subr.bf16.mxu0 %v2662_v20  ;;  %1472 = vmatprep.subr.bf16.mxu1 %v2665_v21 }
 0x225   :  { %1432 = vmatpush1.bf16.msra.mxu0 %v2660_v25  ;;  %1473 = vmatpush1.bf16.msra.mxu1 %v2663_v26 }
 0x226   :  { %1433 = vmatprep.subr.bf16.mxu0 %v2668_v27  ;;  %1474 = vmatprep.subr.bf16.mxu1 %v2671_v28 }
 0x229   :  { %1434 = vmatpush1.bf16.msra.mxu0 %v2666_v29  ;;  %1475 = vmatpush1.bf16.msra.mxu1 %v2669_v30 }
 0x22a   :  { %1435 = vmatprep.subr.bf16.mxu0 %v2674_v31  ;;  %1476 = vmatprep.subr.bf16.mxu1 %v2677_v32 }
 0x22d   :  { %1436 = vmatpush1.bf16.msra.mxu0 %v2672_v33  ;;  %1477 = vmatpush1.bf16.msra.mxu1 %v2675_v34 }
 0x22e   :  { %1437 = vmatprep.subr.bf16.mxu0 %v2680_v35  ;;  %1478 = vmatprep.subr.bf16.mxu1 %v2683_v36 }
 0x231   :  { %1438 = vmatpush1.bf16.msra.mxu0 %v2678_v37  ;;  %1479 = vmatpush1.bf16.msra.mxu1 %v2681_v38 }
 0x232   :  { %1439 = vmatprep.subr.bf16.mxu0 %v2686_v39  ;;  %1480 = vmatprep.subr.bf16.mxu1 %v2689_v40 }
 0x235   :  { %1440 = vmatpush2.bf16.msra.mxu0 %v2684_v41  ;;  %1481 = vmatpush2.bf16.msra.mxu1 %v2687_v42 }
 0x236   :  { %1441 = vmatprep.subr.bf16.mxu0 %v2692_v43  ;;  %1482 = vmatprep.subr.bf16.mxu1 %v2695_v44 }
 0x239   :  { %1442 = vmatpush2.bf16.msra.mxu0 %v2690_v45  ;;  %1483 = vmatpush2.bf16.msra.mxu1 %v2693_v46 }
 0x23a   :  { %1443 = vmatprep.subr.bf16.mxu0 %v2698_v47  ;;  %1484 = vmatprep.subr.bf16.mxu1 %v2701_v48 }
 0x23d   :  { %1444 = vmatpush2.bf16.msra.mxu0 %v2696_v49  ;;  %1485 = vmatpush2.bf16.msra.mxu1 %v2699_v50 }
 0x23e   :  { %1445 = vmatprep.subr.bf16.mxu0 %v2704_v51  ;;  %1486 = vmatprep.subr.bf16.mxu1 %v2707_v52 }
 0x241   :  { %1446 = vmatpush2.bf16.msra.mxu0 %v2702_v53  ;;  %1487 = vmatpush2.bf16.msra.mxu1 %v2705_v54 }
 0x242   :  { %1447 = vmatprep.subr.bf16.mxu0 %v2710_v55  ;;  %1488 = vmatprep.subr.bf16.mxu1 %v2713_v56 }
 0x245   :  { %1448 = vmatpush2.bf16.msra.mxu0 %v2708_v57  ;;  %1489 = vmatpush2.bf16.msra.mxu1 %v2711_v58 }
 0x246   :  { %1449 = vmatprep.subr.bf16.mxu0 %v2716_v59  ;;  %1490 = vmatprep.subr.bf16.mxu1 %v2719_v60  ;;  %v2881_v60 = vmov 1966171168  }
 0x249   :  { %1450 = vmatpush2.bf16.msra.mxu0 %v2714_v61  ;;  %1491 = vmatpush2.bf16.msra.mxu1 %v2717_v62  ;;  %v972_v61 = vunpack.c.l.s4 %v2881_v60  ;;  %v1097_v60 = vsub.s32 3, %v3062_v22 }
 0x24a   :  { %1451 = vmatprep.subr.bf16.mxu0 %v2722_v63  ;;  %1492 = vmatprep.subr.bf16.mxu1 %v2725_v1 }
 0x24b   :  { %v973_v62 = vunpack.c.0.s8 %v972_v61 }
 0x24d   :  { %1452 = vmatpush2.bf16.msra.mxu0 %v2720_v2  ;;  %1493 = vmatpush2.bf16.msra.mxu1 %v2723_v3  ;;  %v976_v1 = vsub.s32 %v973_v62, %v3062_v22 }
 0x24e   :  { %1453 = vmatprep.subr.bf16.mxu0 %v2728_v4  ;;  %1494 = vmatprep.subr.bf16.mxu1 %v2731_v5  ;;  %v930_v5 = vld [vmem:[%s3484_s9] sm:$0x3] }
 0x251   :  { %1454 = vmatpush2.bf16.msra.mxu0 %v2726_v6  ;;  %1495 = vmatpush2.bf16.msra.mxu1 %v2729_v7  ;;  %v931_v7 = vld [vmem:[%s3485_s10] sm:$0x3] }
 0x2d4   :  { %v882_v11 = vpop.f32.mrf.mxu0  ;;  %v923_v12 = vpop.f32.mrf.mxu1 }
 0x2d5   :  { %v883_v13 = vadd.f32 %v882_v11, %v521_v9  ;;  %v1008_v11 = vrot.slane %v931_v7, %v3065_v23 }
 0x2d6   :  { %v884_v14 = vpop.f32.mrf.mxu0  ;;  %v925_v15 = vpop.f32.mrf.mxu1 }
 0x2d7   :  { %v924_v16 = vadd.f32 %v923_v12, %v883_v13  ;;  %v885_v17 = vadd.f32 %v884_v14, %v525_v10  ;;  %v1004_v10 = vrot.slane %v931_v7, %v3068_v24 }
 0x2d8   :  { %v886_v18 = vpop.f32.mrf.mxu0  ;;  %v927_v19 = vpop.f32.mrf.mxu1 }
 0x2d9   :  { %v932_v20 = vrot.slane %v924_v16, 4  ;;  %v926_v21 = vadd.f32 %v925_v15, %v885_v17 }
 0x2da   :  { %v887_v25 = vpop.f32.mrf.mxu0  ;;  %v928_v26 = vpop.f32.mrf.mxu1 }
 0x2db   :  { %v933_v27 = vadd.f32 %v932_v20, %v924_v16  ;;  %v938_v28 = vrot.slane %v926_v21, 4  ;;  %v2737_v25 = vld [vmem:[#allocation4 + $0xec] ss:$16 sps:$4 sm:$0xff]   ;;  %v2732_v26 = vld [vmem:[#allocation4 + $0xe0] ss:$16 sps:$4 sm:$0xff]  }
 0x2dc   :  { %1831 = vmatprep.subr.bf16.mxu1 %v2737_v25 }
 0x2dd   :  { %v934_v29 = vrot.slane %v933_v27, 2  ;;  %v939_v30 = vadd.f32 %v938_v28, %v926_v21  ;;  %v2740_v28 = vld [vmem:[#allocation4 + $0xc4] ss:$16 sps:$4 sm:$0xff]  }
 0x2df   :  { %v935_v31 = vadd.f32 %v934_v29, %v933_v27  ;;  %v940_v32 = vrot.slane %v939_v30, 2  ;;  %v2735_v27 = vld [vmem:[#allocation4 + $0xe8] ss:$16 sps:$4 sm:$0xff]   ;;  %v2743_v29 = vld [vmem:[#allocation4 + $0xcc] ss:$16 sps:$4 sm:$0xff]  }
 0x2e1   :  { %v936_v33 = vrot.slane %v935_v31, 1  ;;  %v941_v34 = vadd.f32 %v940_v32, %v939_v30  ;;  %v2738_v30 = vld [vmem:[#allocation4 + $0xc0] ss:$16 sps:$4 sm:$0xff]   ;;  %v2746_v32 = vld [vmem:[#allocation4 + $0xa4] ss:$16 sps:$4 sm:$0xff]  }
 0x2e3   :  { %v937_v35 = vadd.f32 %v936_v33, %v935_v31  ;;  %v942_v36 = vrot.slane %v941_v34, 1  ;;  %v2741_v31 = vld [vmem:[#allocation4 + $0xc8] ss:$16 sps:$4 sm:$0xff]   ;;  %v2749_v33 = vld [vmem:[#allocation4 + $0xac] ss:$16 sps:$4 sm:$0xff]  }
 0x2e5   :  { %v944_v37 = vmul.f32 0.125, %v937_v35  ;;  %v943_v38 = vadd.f32 %v942_v36, %v941_v34  ;;  %v2744_v34 = vld [vmem:[#allocation4 + $0xa0] ss:$16 sps:$4 sm:$0xff]   ;;  %v2747_v35 = vld [vmem:[#allocation4 + $0xa8] ss:$16 sps:$4 sm:$0xff]  }
 0x2e6   :  { %v2752_v36 = vld [vmem:[#allocation4 + $0x84] ss:$16 sps:$4 sm:$0xff]  }
 0x2e7   :  { %v946_v39 = vsub.f32 %v924_v16, %v944_v37  ;;  %v945_v40 = vmul.f32 0.125, %v943_v38  ;;  %v2755_v37 = vld [vmem:[#allocation4 + $0x8c] ss:$16 sps:$4 sm:$0xff]   ;;  %v2750_v38 = vld [vmem:[#allocation4 + $0x80] ss:$16 sps:$4 sm:$0xff]  }
 0x2e9   :  { %v948_v41 = vmul.f32 %v946_v39, %v946_v39  ;;  %v947_v42 = vsub.f32 %v926_v21, %v945_v40  ;;  %v2734_v21 = vld [vmem:[#allocation4 + $0xe4] ss:$16 sps:$4 sm:$0xff]  }
 0x2ea   :  { %1778 = vmatprep.subr.bf16.mxu0 %v2734_v21  ;;  %v2758_v40 = vld [vmem:[#allocation4 + $0x64] ss:$16 sps:$4 sm:$0xff]  }
 0x2eb   :  { %v950_v43 = vrot.slane %v948_v41, 4  ;;  %v949_v44 = vmul.f32 %v947_v42, %v947_v42 }
 0x2ed   :  { %v951_v45 = vadd.f32 %v950_v43, %v948_v41  ;;  %v956_v46 = vrot.slane %v949_v44, 4  ;;  %v2761_v41 = vld [vmem:[#allocation4 + $0x6c] ss:$16 sps:$4 sm:$0xff]   ;;  %v2759_v43 = vld [vmem:[#allocation4 + $0x68] ss:$16 sps:$4 sm:$0xff]  }
 0x2ef   :  { %v952_v47 = vrot.slane %v951_v45, 2  ;;  %v957_v48 = vadd.f32 %v956_v46, %v949_v44  ;;  %v2764_v44 = vld [vmem:[#allocation4 + $0x44] ss:$16 sps:$4 sm:$0xff]   ;;  %v2762_v46 = vld [vmem:[#allocation4 + $0x40] ss:$16 sps:$4 sm:$0xff]  }
 0x2f1   :  { %v953_v49 = vadd.f32 %v952_v47, %v951_v45  ;;  %v958_v50 = vrot.slane %v957_v48, 2  ;;  %v2767_v45 = vld [vmem:[#allocation4 + $0x4c] ss:$16 sps:$4 sm:$0xff]   ;;  %v2765_v47 = vld [vmem:[#allocation4 + $0x48] ss:$16 sps:$4 sm:$0xff]  }
 0x2f3   :  { %v954_v51 = vrot.slane %v953_v49, 1  ;;  %v959_v52 = vadd.f32 %v958_v50, %v957_v48  ;;  %v2770_v48 = vld [vmem:[#allocation4 + $0x24] ss:$16 sps:$4 sm:$0xff]   ;;  %v2768_v50 = vld [vmem:[#allocation4 + $0x20] ss:$16 sps:$4 sm:$0xff]  }
 0x2f5   :  { %v955_v53 = vadd.f32 %v954_v51, %v953_v49  ;;  %v960_v54 = vrot.slane %v959_v52, 1  ;;  %v2773_v49 = vld [vmem:[#allocation4 + $0x2c] ss:$16 sps:$4 sm:$0xff]   ;;  %v2771_v51 = vld [vmem:[#allocation4 + $0x28] ss:$16 sps:$4 sm:$0xff]  }
 0x2f7   :  { %v962_v55 = vmul.f32 0.125, %v955_v53  ;;  %v961_v56 = vadd.f32 %v960_v54, %v959_v52  ;;  %v2776_v52 = vld [vmem:[#allocation4 + $0x4] ss:$16 sps:$4 sm:$0xff]   ;;  %v2774_v53 = vld [vmem:[#allocation4] ss:$16 sps:$4 sm:$0xff]  }
 0x2f8   :  { %v2777_v54 = vld [vmem:[#allocation4 + $0x8] ss:$16 sps:$4 sm:$0xff]  }
 0x2f9   :  { %v964_v57 = vadd.f32 1e-05, %v962_v55  ;;  %v963_v58 = vmul.f32 0.125, %v961_v56  ;;  %v2779_v55 = vld [vmem:[#allocation4 + $0xc] ss:$16 sps:$4 sm:$0xff]  }
 0x2fa   :  { %v1081_v56 = vld [vmem:[%s3487_s12] sm:$0xf] }
 0x2fb   :  { %v965_v59 = vadd.f32 1e-05, %v963_v58  ;;  %2790 = vrsqrt.f32 %v964_v57  ;;  %v1093_v57 = vsub.s32 2, %v3062_v22  ;;  %v1086_v58 = vrot.slane %v1081_v56, %v3068_v24 }
 0x2fd   :  { %2792 = vrsqrt.f32 %v965_v59  ;;  %v1090_v59 = vrot.slane %v1081_v56, %v3065_v23 }
 0x308   :  { %v2791_v63 = vpop.eup %2790 }
 0x30a   :  { %v2793_v2 = vpop.eup %2792 }
 0x30b   :  { %v970_v3 = vcombine.low %v2791_v63, %v2793_v2  ;;  %v1094_v63 = vrot.slane %v1081_v56, %v1093_v57 }
 0x30d   :  { %v977_v4 = vrot.slane %v970_v3, %v976_v1 }
 0x30f   :  { %v984_v6 = vrot.slane %v977_v4, %v976_v1 }
 0x311   :  { %v986_v8 = vmul.f32 %v984_v6, %v930_v5  ;;  %v1098_v5 = vrot.slane %v1081_v56, %v1097_v60 }
 0x313   :  { %v995_v9 = vrot.slane %v986_v8, %v3065_v23  ;;  %v991_v12 = vrot.slane %v986_v8, %v3068_v24 }
 0x315   :  { %v999_v13 = vmul.f32 %v995_v9, %v947_v42  ;;  %v998_v14 = vmul.f32 %v991_v12, %v946_v39  ;;  %v2753_v39 = vld [vmem:[#allocation4 + $0x88] ss:$16 sps:$4 sm:$0xff]   ;;  %v2756_v42 = vld [vmem:[#allocation4 + $0x60] ss:$16 sps:$4 sm:$0xff]  }
 0x317   :  { %v1012_v15 = vadd.f32 %v1008_v11, %v999_v13  ;;  %v1011_v16 = vadd.f32 %v1004_v10, %v998_v14 }
 0x319   :  { %v1014_v17 = vmax.f32 %v1012_v15, 0.0  ;;  %v1013_v18 = vmax.f32 %v1011_v16, 0.0 }
 0x31b   :  { %v1016_v19 = vpack.c.bf16 %v1014_v17, %v1014_v17  ;;  %v1015_v20 = vpack.c.bf16 %v1013_v18, %v1013_v18 }
 0x31d   :  { %1455 = vmatprep.mubr.bf16.mxu0 %v1016_v19  ;;  %1496 = vmatprep.mubr.bf16.mxu1 %v1016_v19 }
 0x31e   :  { %1456 = vmatmul.mubr.bf16.vlgmr.msra.gmra.mxu0 %v1015_v20  ;;  %1497 = vmatmul.mubr.bf16.vlgmr.msra.gmra.mxu1 %v1015_v20 }
 0x31f   :  { %1810 = vmatprep.mubr.bf16.mxu0 %v2880_v0  ;;  %1863 = vmatprep.mubr.bf16.mxu1 %v2880_v0 }
 0x320   :  { %1779 = vmatpush1.bf16.msra.mxu0 %v2732_v26  ;;  %1832 = vmatpush1.bf16.msra.mxu1 %v2735_v27 }
 0x321   :  { %1780 = vmatprep.subr.bf16.mxu0 %v2740_v28  ;;  %1833 = vmatprep.subr.bf16.mxu1 %v2743_v29 }
 0x324   :  { %1781 = vmatpush1.bf16.msra.mxu0 %v2738_v30  ;;  %1834 = vmatpush1.bf16.msra.mxu1 %v2741_v31 }
 0x325   :  { %1782 = vmatprep.subr.bf16.mxu0 %v2746_v32  ;;  %1835 = vmatprep.subr.bf16.mxu1 %v2749_v33 }
 0x328   :  { %1783 = vmatpush1.bf16.msra.mxu0 %v2744_v34  ;;  %1836 = vmatpush1.bf16.msra.mxu1 %v2747_v35 }
 0x329   :  { %1784 = vmatprep.subr.bf16.mxu0 %v2752_v36  ;;  %1837 = vmatprep.subr.bf16.mxu1 %v2755_v37 }
 0x32c   :  { %1785 = vmatpush1.bf16.msra.mxu0 %v2750_v38  ;;  %1838 = vmatpush1.bf16.msra.mxu1 %v2753_v39 }
 0x32d   :  { %1786 = vmatprep.subr.bf16.mxu0 %v2758_v40  ;;  %1839 = vmatprep.subr.bf16.mxu1 %v2761_v41 }
 0x330   :  { %1787 = vmatpush1.bf16.msra.mxu0 %v2756_v42  ;;  %1840 = vmatpush1.bf16.msra.mxu1 %v2759_v43 }
 0x331   :  { %1788 = vmatprep.subr.bf16.mxu0 %v2764_v44  ;;  %1841 = vmatprep.subr.bf16.mxu1 %v2767_v45  ;;  %v1505_v44 = vld [vmem:[%s3488_s13] sm:$0x1] }
 0x334   :  { %1789 = vmatpush1.bf16.msra.mxu0 %v2762_v46  ;;  %1842 = vmatpush1.bf16.msra.mxu1 %v2765_v47 }
 0x335   :  { %1790 = vmatprep.subr.bf16.mxu0 %v2770_v48  ;;  %1843 = vmatprep.subr.bf16.mxu1 %v2773_v49  ;;  %v2392_v48 = vld [vmem:[%s3489_s14] ss:$0 sm:$0xff] }
 0x338   :  { %1791 = vmatpush1.bf16.msra.mxu0 %v2768_v50  ;;  %1844 = vmatpush1.bf16.msra.mxu1 %v2771_v51 }
 0x339   :  { %1792 = vmatprep.subr.bf16.mxu0 %v2776_v52  ;;  %1845 = vmatprep.subr.bf16.mxu1 %v2779_v55 }
 0x33c   :  { %1793 = vmatpush1.bf16.msra.mxu0 %v2774_v53  ;;  %1846 = vmatpush1.bf16.msra.mxu1 %v2777_v54 }
 0x3de   :  { %v1457_v61 = vpop.f32.mrf.mxu0  ;;  %v1498_v62 = vpop.f32.mrf.mxu1 }
 0x3df   :  { %v1458_v3 = vadd.f32 %v1457_v61, %v1086_v58  ;;  %v1499_v8 = vadd.f32 %v1498_v62, %v1094_v63 }
 0x3e0   :  { %v1459_v1 = vpop.f32.mrf.mxu0  ;;  %v1500_v2 = vpop.f32.mrf.mxu1 }
 0x3e1   :  { %v1460_v4 = vadd.f32 %v1459_v1, %v1090_v59  ;;  %v1501_v12 = vadd.f32 %v1500_v2, %v1098_v5  ;;  %v2780_v2 = vld [vmem:[%s3494_s19 + $0x38] sm:$0xff]  }
 0x3e2   :  { %v1461_v6 = vpop.f32.mrf.mxu0  ;;  %v1502_v7 = vpop.f32.mrf.mxu1  ;;  %2479 = vmatprep.subr.bf16.mxu0 %v2780_v2  ;;  %v2784_v5 = vld [vmem:[%s3494_s19 + $0x18] sm:$0xff]  }
 0x3e3   :  { %v1507_v9 = vadd.f32 %v1460_v4, %v1458_v3  ;;  %v2785_v6 = vld [vmem:[%s3494_s19 + $0x10] sm:$0xff]   ;;  %v2786_v7 = vld [vmem:[%s3494_s19 + $0x8] sm:$0xff]  }
 0x3e4   :  { %v1462_v10 = vpop.f32.mrf.mxu0  ;;  %v1503_v11 = vpop.f32.mrf.mxu1 }
 0x3e5   :  { %v1508_v13 = vadd.f32 %v1507_v9, %v1499_v8  ;;  %v1596_v10 = vld [vmem:[%s3491_s16] sm:$0xf] }
 0x3e7   :  { %v1509_v14 = vadd.f32 %v1508_v13, %v1501_v12 }
 0x3e9   :  { %v1510_v15 = vrot.slane %v1509_v14, 4 }
 0x3eb   :  { %v1511_v16 = vadd.f32 %v1510_v15, %v1509_v14  ;;  %v1601_v14 = vrot.slane %v1596_v10, %v3068_v24 }
 0x3ed   :  { %v1512_v17 = vrot.slane %v1511_v16, 2 }
 0x3ef   :  { %v1513_v18 = vadd.f32 %v1512_v17, %v1511_v16 }
 0x3f1   :  { %v1514_v19 = vrot.slane %v1513_v18, 1 }
 0x3f3   :  { %v1515_v20 = vadd.f32 %v1514_v19, %v1513_v18 }
 0x3f5   :  { %v1516_v21 = vmul.f32 0.03125, %v1515_v20 }
 0x3f7   :  { %v1517_v25 = vsub.f32 %v1458_v3, %v1516_v21  ;;  %v1518_v26 = vsub.f32 %v1460_v4, %v1516_v21  ;;  %v1519_v27 = vsub.f32 %v1499_v8, %v1516_v21  ;;  %v1520_v28 = vsub.f32 %v1501_v12, %v1516_v21  ;;  %v2781_v3 = vld [vmem:[%s3494_s19 + $0x30] sm:$0xff]   ;;  %v2783_v4 = vld [vmem:[%s3494_s19 + $0x20] sm:$0xff]  }
 0x3f8   :  { %v2787_v8 = vld [vmem:[%s3494_s19] sm:$0xff]  }
 0x3f9   :  { %v1521_v29 = vmul.f32 %v1517_v25, %v1517_v25  ;;  %v1522_v30 = vmul.f32 %v1518_v26, %v1518_v26  ;;  %v1523_v31 = vmul.f32 %v1519_v27, %v1519_v27  ;;  %v1524_v33 = vmul.f32 %v1520_v28, %v1520_v28 }
 0x3fb   :  { %v1525_v32 = vadd.f32 %v1522_v30, %v1521_v29 }
 0x3fd   :  { %v1526_v34 = vadd.f32 %v1525_v32, %v1523_v31 }
 0x3ff   :  { %v1527_v35 = vadd.f32 %v1526_v34, %v1524_v33 }
 0x401   :  { %v1528_v36 = vrot.slane %v1527_v35, 4 }
 0x403   :  { %v1529_v37 = vadd.f32 %v1528_v36, %v1527_v35 }
 0x405   :  { %v1530_v38 = vrot.slane %v1529_v37, 2 }
 0x407   :  { %v1531_v39 = vadd.f32 %v1530_v38, %v1529_v37  ;;  %v1609_v38 = vrot.slane %v1596_v10, %v1093_v57 }
 0x409   :  { %v1532_v40 = vrot.slane %v1531_v39, 1 }
 0x40b   :  { %v1533_v41 = vadd.f32 %v1532_v40, %v1531_v39 }
 0x40d   :  { %v1534_v42 = vmul.f32 0.03125, %v1533_v41 }
 0x40f   :  { %v1535_v43 = vadd.f32 1e-05, %v1534_v42 }
 0x411   :  { %2794 = vrsqrt.f32 %v1535_v43 }
 0x41e   :  { %v2795_v45 = vpop.eup %2794 }
 0x41f   :  { %v1537_v46 = vmul.f32 %v2795_v45, %v1505_v44 }
 0x421   :  { %v1542_v47 = vrot.slane %v1537_v46, %v3068_v24 }
 0x423   :  { %v1544_v49 = vmul.f32 %v1542_v47, %v1517_v25  ;;  %v1545_v50 = vmul.f32 %v1542_v47, %v1518_v26  ;;  %v1547_v51 = vmul.f32 %v1542_v47, %v1520_v28  ;;  %v1546_v54 = vmul.f32 %v1542_v47, %v1519_v27 }
 0x424   :  { %v1605_v26 = vrot.slane %v1596_v10, %v3065_v23 }
 0x425   :  { %v1554_v52 = vadd.f32 %v2392_v48, %v1544_v49  ;;  %v1555_v53 = vadd.f32 %v2392_v48, %v1545_v50  ;;  %v1556_v59 = vadd.f32 %v2392_v48, %v1546_v54  ;;  %v1557_v61 = vadd.f32 %v2392_v48, %v1547_v51 }
 0x426   :  { %v1613_v48 = vrot.slane %v1596_v10, %v1097_v60 }
 0x427   :  { %v1558_v55 = vmax.f32 %v1554_v52, 0.0  ;;  %v1559_v56 = vmax.f32 %v1555_v53, 0.0  ;;  %v1560_v62 = vmax.f32 %v1556_v59, 0.0  ;;  %v1561_v63 = vmax.f32 %v1557_v61, 0.0 }
 0x429   :  { %v1562_v58 = vpack.c.bf16 %v1559_v56, %v1558_v55  ;;  %v1563_v1 = vpack.c.bf16 %v1561_v63, %v1560_v62 }
 0x42b   :  { %1811 = vmatmul.mubr.bf16.vlgmr.msra.gmra.mxu0 %v1562_v58  ;;  %1864 = vmatmul.mubr.bf16.vlgmr.msra.gmra.mxu1 %v1562_v58 }
 0x42c   :  { %1820 = vmatprep.mubr.bf16.mxu0 %v2880_v0  ;;  %1873 = vmatprep.mubr.bf16.mxu1 %v2880_v0  ;;  %v2782_v0 = vld [vmem:[%s3494_s19 + $0x28] sm:$0xff]  }
 0x42d   :  { %2480 = vmatpush3.bf16.msra.mxu0 %v2780_v2 }
 0x42e   :  { %2481 = vmatprep.subr.bf16.mxu0 %v2781_v3 }
 0x431   :  { %2482 = vmatpush3.bf16.msra.mxu0 %v2781_v3 }
 0x432   :  { %2483 = vmatprep.subr.bf16.mxu0 %v2782_v0 }
 0x433   :  { %1821 = vmatmul.mubr.bf16.gmra.mxu0 %v1563_v1  ;;  %1874 = vmatmul.mubr.bf16.gmra.mxu1 %v1563_v1 }
 0x435   :  { %2484 = vmatpush3.bf16.msra.mxu0 %v2782_v0 }
 0x436   :  { %2485 = vmatprep.subr.bf16.mxu0 %v2783_v4 }
 0x439   :  { %2486 = vmatpush3.bf16.msra.mxu0 %v2783_v4 }
 0x43a   :  { %2487 = vmatprep.subr.bf16.mxu0 %v2784_v5 }
 0x43d   :  { %2488 = vmatpush3.bf16.msra.mxu0 %v2784_v5 }
 0x43e   :  { %2489 = vmatprep.subr.bf16.mxu0 %v2785_v6 }
 0x441   :  { %2490 = vmatpush3.bf16.msra.mxu0 %v2785_v6 }
 0x442   :  { %2491 = vmatprep.subr.bf16.mxu0 %v2786_v7 }
 0x445   :  { %2492 = vmatpush3.bf16.msra.mxu0 %v2786_v7 }
 0x446   :  { %2493 = vmatprep.subr.bf16.mxu0 %v2787_v8 }
 0x449   :  { %2494 = vmatpush3.bf16.msra.mxu0 %v2787_v8 }
 0x4eb   :  { %v1812_v9 = vpop.f32.mrf.mxu0  ;;  %v1865_v11 = vpop.f32.mrf.mxu1 }
 0x4ec   :  { %v1813_v19 = vadd.f32 %v1812_v9, %v1601_v14  ;;  %v1866_v23 = vadd.f32 %v1865_v11, %v1609_v38 }
 0x4ed   :  { %v1814_v12 = vpop.f32.mrf.mxu0  ;;  %v1867_v15 = vpop.f32.mrf.mxu1 }
 0x4ee   :  { %v1815_v32 = vadd.f32 %v1814_v12, %v1605_v26  ;;  %v1868_v53 = vadd.f32 %v1867_v15, %v1613_v48 }
 0x4ef   :  { %v1816_v13 = vpop.f32.mrf.mxu0  ;;  %v1869_v21 = vpop.f32.mrf.mxu1 }
 0x4f0   :  { %v1817_v17 = vadd.f32 %v1816_v13, %v1601_v14  ;;  %v1870_v45 = vadd.f32 %v1869_v21, %v1609_v38 }
 0x4f1   :  { %v1818_v16 = vpop.f32.mrf.mxu0  ;;  %v1871_v31 = vpop.f32.mrf.mxu1 }
 0x4f2   :  { %v1886_v27 = vadd.f32 %v1817_v17, %v1813_v19  ;;  %v1819_v34 = vadd.f32 %v1818_v16, %v1605_v26  ;;  %v1872_v57 = vadd.f32 %v1871_v31, %v1613_v48 }
 0x4f3   :  { %v1822_v18 = vpop.f32.mrf.mxu0  ;;  %v1875_v36 = vpop.f32.mrf.mxu1 }
 0x4f4   :  { %v1823_v20 = vadd.f32 %v1822_v18, %v1601_v14  ;;  %v1876_v49 = vadd.f32 %v1875_v36, %v1609_v38 }
 0x4f5   :  { %v1824_v25 = vpop.f32.mrf.mxu0  ;;  %v1877_v43 = vpop.f32.mrf.mxu1 }
 0x4f6   :  { %v1887_v29 = vadd.f32 %v1886_v27, %v1823_v20  ;;  %v1825_v39 = vadd.f32 %v1824_v25, %v1605_v26  ;;  %v1878_v58 = vadd.f32 %v1877_v43, %v1613_v48 }
 0x4f7   :  { %v1826_v28 = vpop.f32.mrf.mxu0  ;;  %v1879_v47 = vpop.f32.mrf.mxu1 }
 0x4f8   :  { %v1827_v30 = vadd.f32 %v1826_v28, %v1601_v14  ;;  %v1880_v51 = vadd.f32 %v1879_v47, %v1609_v38 }
 0x4f9   :  { %v1828_v37 = vpop.f32.mrf.mxu0  ;;  %v1881_v56 = vpop.f32.mrf.mxu1 }
 0x4fa   :  { %v1888_v33 = vadd.f32 %v1887_v29, %v1827_v30  ;;  %v1829_v41 = vadd.f32 %v1828_v37, %v1605_v26  ;;  %v1882_v61 = vadd.f32 %v1881_v56, %v1613_v48 }
 0x4fc   :  { %v1889_v35 = vadd.f32 %v1888_v33, %v1815_v32 }
 0x4fe   :  { %v1890_v40 = vadd.f32 %v1889_v35, %v1819_v34 }
 0x500   :  { %v1891_v42 = vadd.f32 %v1890_v40, %v1825_v39 }
 0x502   :  { %v1892_v44 = vadd.f32 %v1891_v42, %v1829_v41 }
 0x504   :  { %v1893_v46 = vadd.f32 %v1892_v44, %v1866_v23 }
 0x506   :  { %v1894_v50 = vadd.f32 %v1893_v46, %v1870_v45 }
 0x508   :  { %v1895_v52 = vadd.f32 %v1894_v50, %v1876_v49 }
 0x50a   :  { %v1896_v54 = vadd.f32 %v1895_v52, %v1880_v51 }
 0x50c   :  { %v1897_v55 = vadd.f32 %v1896_v54, %v1868_v53 }
 0x50e   :  { %v1898_v59 = vadd.f32 %v1897_v55, %v1872_v57 }
 0x510   :  { %v1899_v62 = vadd.f32 %v1898_v59, %v1878_v58 }
 0x512   :  { %v1900_v63 = vadd.f32 %v1899_v62, %v1882_v61 }
 0x514   :  { %v1901_v1 = vrot.slane %v1900_v63, 4 }
 0x516   :  { %v1902_v2 = vadd.f32 %v1901_v1, %v1900_v63 }
 0x518   :  { %v1903_v3 = vrot.slane %v1902_v2, 2 }
 0x51a   :  { %v1904_v0 = vadd.f32 %v1903_v3, %v1902_v2 }
 0x51c   :  { %v1905_v22 = vrot.slane %v1904_v0, 1 }
 0x51e   :  { %v1906_v60 = vadd.f32 %v1905_v22, %v1904_v0  ;;  %v2425_v0 = vld [vmem:[%s3493_s18] ss:$0 sm:$0xff] }
 0x520   :  { %v1907_v4 = vmul.f32 0.0078125, %v1906_v60 }
 0x522   :  { %v1908_v5 = vsub.f32 %v1813_v19, %v1907_v4  ;;  %v1909_v6 = vsub.f32 %v1817_v17, %v1907_v4  ;;  %v1910_v7 = vsub.f32 %v1823_v20, %v1907_v4  ;;  %v1911_v10 = vsub.f32 %v1827_v30, %v1907_v4 }
 0x523   :  { %v1912_v11 = vsub.f32 %v1815_v32, %v1907_v4  ;;  %v1913_v14 = vsub.f32 %v1819_v34, %v1907_v4  ;;  %v1914_v18 = vsub.f32 %v1825_v39, %v1907_v4  ;;  %v1915_v26 = vsub.f32 %v1829_v41, %v1907_v4 }
 0x524   :  { %v1924_v8 = vmul.f32 %v1908_v5, %v1908_v5  ;;  %v1925_v9 = vmul.f32 %v1909_v6, %v1909_v6  ;;  %v1926_v12 = vmul.f32 %v1910_v7, %v1910_v7  ;;  %v1927_v15 = vmul.f32 %v1911_v10, %v1911_v10 }
 0x525   :  { %v1928_v21 = vmul.f32 %v1912_v11, %v1912_v11  ;;  %v1929_v27 = vmul.f32 %v1913_v14, %v1913_v14  ;;  %v3348_v29 = vsub.f32 %v1866_v23, %v1907_v4  ;;  %v1930_v19 = vmul.f32 %v1914_v18, %v1914_v18 }
 0x526   :  { %v1940_v13 = vadd.f32 %v1925_v9, %v1924_v8  ;;  %v3350_v20 = vsub.f32 %v1870_v45, %v1907_v4  ;;  %v1931_v31 = vmul.f32 %v1915_v26, %v1915_v26  ;;  %v3352_v32 = vsub.f32 %v1876_v49, %v1907_v4 }
 0x527   :  { %v1932_v33 = vmul.f32 %v3348_v29, %v3348_v29  ;;  %v3356_v35 = vsub.f32 %v1880_v51, %v1907_v4  ;;  %v3360_v38 = vsub.f32 %v1868_v53, %v1907_v4  ;;  %v3364_v41 = vsub.f32 %v1872_v57, %v1907_v4 }
 0x528   :  { %v1941_v16 = vadd.f32 %v1940_v13, %v1926_v12  ;;  %v1933_v36 = vmul.f32 %v3350_v20, %v3350_v20  ;;  %v1934_v39 = vmul.f32 %v3352_v32, %v3352_v32  ;;  %v3368_v23 = vsub.f32 %v1878_v58, %v1907_v4 }
 0x529   :  { %v1935_v42 = vmul.f32 %v3356_v35, %v3356_v35  ;;  %v1936_v44 = vmul.f32 %v3360_v38, %v3360_v38  ;;  %v1923_v46 = vsub.f32 %v1882_v61, %v1907_v4  ;;  %v1937_v47 = vmul.f32 %v3364_v41, %v3364_v41  ;;  %v1884_v61 = vld [vmem:[%s3492_s17] sm:$0x1] }
 0x52a   :  { %v1942_v25 = vadd.f32 %v1941_v16, %v1927_v15  ;;  %v1938_v49 = vmul.f32 %v3368_v23, %v3368_v23 }
 0x52b   :  { %v1939_v51 = vmul.f32 %v1923_v46, %v1923_v46 }
 0x52c   :  { %v1943_v28 = vadd.f32 %v1942_v25, %v1928_v21 }
 0x52e   :  { %v1944_v17 = vadd.f32 %v1943_v28, %v1929_v27 }
 0x530   :  { %v1945_v30 = vadd.f32 %v1944_v17, %v1930_v19 }
 0x532   :  { %v1946_v34 = vadd.f32 %v1945_v30, %v1931_v31 }
 0x534   :  { %v1947_v37 = vadd.f32 %v1946_v34, %v1932_v33 }
 0x536   :  { %v1948_v40 = vadd.f32 %v1947_v37, %v1933_v36 }
 0x538   :  { %v1949_v43 = vadd.f32 %v1948_v40, %v1934_v39 }
 0x53a   :  { %v1950_v45 = vadd.f32 %v1949_v43, %v1935_v42 }
 0x53c   :  { %v1951_v48 = vadd.f32 %v1950_v45, %v1936_v44 }
 0x53e   :  { %v1952_v50 = vadd.f32 %v1951_v48, %v1937_v47 }
 0x540   :  { %v1953_v52 = vadd.f32 %v1952_v50, %v1938_v49 }
 0x542   :  { %v1954_v53 = vadd.f32 %v1953_v52, %v1939_v51 }
 0x544   :  { %v1955_v54 = vrot.slane %v1954_v53, 4 }
 0x546   :  { %v1956_v57 = vadd.f32 %v1955_v54, %v1954_v53 }
 0x548   :  { %v1957_v55 = vrot.slane %v1956_v57, 2 }
 0x54a   :  { %v1958_v56 = vadd.f32 %v1957_v55, %v1956_v57 }
 0x54c   :  { %v1959_v58 = vrot.slane %v1958_v56, 1 }
 0x54e   :  { %v1960_v59 = vadd.f32 %v1959_v58, %v1958_v56 }
 0x550   :  { %v1961_v62 = vmul.f32 0.0078125, %v1960_v59 }
 0x552   :  { %v1962_v63 = vadd.f32 1e-05, %v1961_v62 }
 0x554   :  { %2796 = vrsqrt.f32 %v1962_v63 }
 0x561   :  { %v2797_v1 = vpop.eup %2796 }
 0x562   :  { %v1964_v2 = vmul.f32 %v2797_v1, %v1884_v61 }
 0x564   :  { %v1969_v3 = vrot.slane %v1964_v2, %v3068_v24 }
 0x566   :  { %v1986_v22 = vmul.f32 %v1969_v3, %v1923_v46  ;;  %v1971_v60 = vmul.f32 %v1969_v3, %v1908_v5  ;;  %v1972_v4 = vmul.f32 %v1969_v3, %v1909_v6  ;;  %v1973_v8 = vmul.f32 %v1969_v3, %v1910_v7 }
 0x567   :  { %v1974_v9 = vmul.f32 %v1969_v3, %v1911_v10  ;;  %v1975_v12 = vmul.f32 %v1969_v3, %v1912_v11  ;;  %v1976_v13 = vmul.f32 %v1969_v3, %v1913_v14  ;;  %v1977_v15 = vmul.f32 %v1969_v3, %v1914_v18 }
 0x568   :  { %v1993_v16 = vadd.f32 %v2425_v0, %v1971_v60  ;;  %v1994_v21 = vadd.f32 %v2425_v0, %v1972_v4  ;;  %v1995_v25 = vadd.f32 %v2425_v0, %v1973_v8  ;;  %v1978_v27 = vmul.f32 %v1969_v3, %v1915_v26 }
 0x569   :  { %v1996_v28 = vadd.f32 %v2425_v0, %v1974_v9  ;;  %v1997_v19 = vadd.f32 %v2425_v0, %v1975_v12  ;;  %v1998_v17 = vadd.f32 %v2425_v0, %v1976_v13  ;;  %v1999_v24 = vadd.f32 %v2425_v0, %v1977_v15 }
 0x56a   :  { %v2009_v31 = vmax.f32 %v1993_v16, 0.0  ;;  %v2010_v30 = vmax.f32 %v1994_v21, 0.0  ;;  %v2011_v33 = vmax.f32 %v1995_v25, 0.0  ;;  %v2000_v34 = vadd.f32 %v2425_v0, %v1978_v27 }
 0x56b   :  { %v2012_v36 = vmax.f32 %v1996_v28, 0.0  ;;  %v2013_v5 = vmax.f32 %v1997_v19, 0.0  ;;  %v2014_v6 = vmax.f32 %v1998_v17, 0.0  ;;  %v2015_v7 = vmax.f32 %v1999_v24, 0.0 }
 0x56c   :  { %v2025_v10 = vpack.c.bf16 %v2010_v30, %v2009_v31  ;;  %v2016_v11 = vmax.f32 %v2000_v34, 0.0  ;;  %v1979_v14 = vmul.f32 %v1969_v3, %v3348_v29  ;;  %v1980_v18 = vmul.f32 %v1969_v3, %v3350_v20 }
 0x56d   :  { %v2026_v37 = vpack.c.bf16 %v2012_v36, %v2011_v33  ;;  %v1981_v26 = vmul.f32 %v1969_v3, %v3352_v32  ;;  %v1982_v39 = vmul.f32 %v1969_v3, %v3356_v35  ;;  %v2027_v40 = vpack.c.bf16 %v2014_v6, %v2013_v5 }
 0x56e   :  { %2495 = vmatprep.mubr.bf16.mxu0 %v2025_v10  ;;  %v2028_v42 = vpack.c.bf16 %v2016_v11, %v2015_v7  ;;  %v2001_v43 = vadd.f32 %v2425_v0, %v1979_v14  ;;  %v2002_v44 = vadd.f32 %v2425_v0, %v1980_v18  ;;  %v1985_v47 = vmul.f32 %v1969_v3, %v3368_v23 }
 0x56f   :  { %2496 = vmatmul.mubr.bf16.vlgmr.msra.gmra.mxu0 %v2026_v37  ;;  %v2003_v45 = vadd.f32 %v2425_v0, %v1981_v26  ;;  %v2004_v46 = vadd.f32 %v2425_v0, %v1982_v39  ;;  %v2008_v48 = vadd.f32 %v2425_v0, %v1986_v22  ;;  %v1983_v20 = vmul.f32 %v1969_v3, %v3360_v38  ;;  %v3393_v38 = vld [vmem:[%s3495_s20] ss:$0 sm:$0xff] }
 0x570   :  { %2499 = vmatprep.mubr.bf16.mxu0 %v2027_v40  ;;  %v2007_v50 = vadd.f32 %v2425_v0, %v1985_v47  ;;  %v2017_v32 = vmax.f32 %v2001_v43, 0.0  ;;  %v2018_v51 = vmax.f32 %v2002_v44, 0.0  ;;  %v1984_v35 = vmul.f32 %v1969_v3, %v3364_v41 }
 0x571   :  { %v2019_v29 = vmax.f32 %v2003_v45, 0.0  ;;  %v2020_v49 = vmax.f32 %v2004_v46, 0.0  ;;  %v2024_v52 = vmax.f32 %v2008_v48, 0.0  ;;  %v2005_v56 = vadd.f32 %v2425_v0, %v1983_v20 }
 0x572   :  { %v2023_v54 = vmax.f32 %v2007_v50, 0.0  ;;  %v2029_v55 = vpack.c.bf16 %v2018_v51, %v2017_v32  ;;  %v2006_v58 = vadd.f32 %v2425_v0, %v1984_v35 }
 0x573   :  { %v2030_v53 = vpack.c.bf16 %v2020_v49, %v2019_v29  ;;  %v2021_v23 = vmax.f32 %v2005_v56, 0.0 }
 0x574   :  { %v2032_v57 = vpack.c.bf16 %v2024_v52, %v2023_v54  ;;  %v2022_v59 = vmax.f32 %v2006_v58, 0.0 }
 0x576   :  { %v2031_v62 = vpack.c.bf16 %v2022_v59, %v2021_v23 }
 0x577   :  { %2500 = vmatmul.mubr.bf16.gmra.mxu0 %v2028_v42 }
 0x578   :  { %2503 = vmatprep.mubr.bf16.mxu0 %v2029_v55 }
 0x57f   :  { %2504 = vmatmul.mubr.bf16.gmra.mxu0 %v2030_v53 }
 0x580   :  { %2507 = vmatprep.mubr.bf16.mxu0 %v2031_v62 }
 0x587   :  { %2508 = vmatmul.mubr.bf16.gmra.mxu0 %v2032_v57 }
 0x62f   :  { %v2497_v41 = vpop.f32.mrf.mxu0 }
 0x630   :  { %v2147_v63 = vadd.f32 %v2497_v41, %v3393_v38 }
 0x631   :  { %v2138_v61 = vpop.f32.mrf.mxu0 }
 0x632   :  { %2798 = vtanh.f32 %v2147_v63  ;;  %v2139_v1 = vadd.f32 %v3393_v38, %v2138_v61 }
 0x633   :  { %v2498_v2 = vpop.f32.mrf.mxu0 }
 0x634   :  { %2800 = vtanh.f32 %v2139_v1  ;;  %v2150_v3 = vadd.f32 %v2498_v2, %v3393_v38 }
 0x635   :  { %v2141_v0 = vpop.f32.mrf.mxu0 }
 0x636   :  { %2802 = vtanh.f32 %v2150_v3  ;;  %v2142_v22 = vadd.f32 %v3393_v38, %v2141_v0 }
 0x637   :  { %v2501_v60 = vpop.f32.mrf.mxu0 }
 0x638   :  { %2804 = vtanh.f32 %v2142_v22  ;;  %v2163_v4 = vadd.f32 %v2501_v60, %v3393_v38 }
 0x639   :  { %v2154_v8 = vpop.f32.mrf.mxu0 }
 0x63a   :  { %2806 = vtanh.f32 %v2163_v4  ;;  %v2155_v9 = vadd.f32 %v3393_v38, %v2154_v8 }
 0x63b   :  { %v2502_v12 = vpop.f32.mrf.mxu0 }
 0x63c   :  { %2808 = vtanh.f32 %v2155_v9  ;;  %v2166_v13 = vadd.f32 %v2502_v12, %v3393_v38 }
 0x63d   :  { %v2157_v15 = vpop.f32.mrf.mxu0 }
 0x63e   :  { %2810 = vtanh.f32 %v2166_v13  ;;  %v2158_v16 = vadd.f32 %v3393_v38, %v2157_v15 }
 0x63f   :  { %v2799_v21 = vpop.eup %2798  ;;  %v2505_v25 = vpop.f32.mrf.mxu0 }
 0x640   :  { %2220 = vst.msk [vmem:[%s3496_s21 + $0x10] sm:$0xff] %vm2217_vm1, %v2799_v21  ;;  %2812 = vtanh.f32 %v2158_v16  ;;  %v2179_v27 = vadd.f32 %v2505_v25, %v3393_v38 }
 0x641   :  { %v2801_v28 = vpop.eup %2800  ;;  %v2170_v19 = vpop.f32.mrf.mxu0 }
 0x642   :  { %2218 = vst.msk [vmem:[%s3496_s21] sm:$0xff] %vm2217_vm1, %v2801_v28  ;;  %2814 = vtanh.f32 %v2179_v27  ;;  %v2171_v17 = vadd.f32 %v3393_v38, %v2170_v19 }
 0x643   :  { %v2803_v24 = vpop.eup %2802  ;;  %v2506_v31 = vpop.f32.mrf.mxu0 }
 0x644   :  { %2221 = vst.msk [vmem:[%s3496_s21 + $0x18] sm:$0xff] %vm2217_vm1, %v2803_v24  ;;  %2816 = vtanh.f32 %v2171_v17  ;;  %v2182_v30 = vadd.f32 %v2506_v31, %v3393_v38 }
 0x645   :  { %v2805_v33 = vpop.eup %2804  ;;  %v2173_v34 = vpop.f32.mrf.mxu0 }
 0x646   :  { %2219 = vst.msk [vmem:[%s3496_s21 + $0x8] sm:$0xff] %vm2217_vm1, %v2805_v33  ;;  %2818 = vtanh.f32 %v2182_v30  ;;  %v2174_v36 = vadd.f32 %v3393_v38, %v2173_v34 }
 0x647   :  { %v2807_v5 = vpop.eup %2806  ;;  %v2509_v6 = vpop.f32.mrf.mxu0 }
 0x648   :  { %2224 = vst.msk [vmem:[%s3496_s21 + $0x30] sm:$0xff] %vm2217_vm1, %v2807_v5  ;;  %2820 = vtanh.f32 %v2174_v36  ;;  %v2195_v7 = vadd.f32 %v2509_v6, %v3393_v38 }
 0x649   :  { %v2809_v10 = vpop.eup %2808  ;;  %v2186_v11 = vpop.f32.mrf.mxu0 }
 0x64a   :  { %2222 = vst.msk [vmem:[%s3496_s21 + $0x20] sm:$0xff] %vm2217_vm1, %v2809_v10  ;;  %2822 = vtanh.f32 %v2195_v7  ;;  %v2187_v14 = vadd.f32 %v3393_v38, %v2186_v11 }
 0x64b   :  { %v2811_v18 = vpop.eup %2810  ;;  %v2510_v37 = vpop.f32.mrf.mxu0 }
 0x64c   :  { %2225 = vst.msk [vmem:[%s3496_s21 + $0x38] sm:$0xff] %vm2217_vm1, %v2811_v18  ;;  %2824 = vtanh.f32 %v2187_v14  ;;  %v2198_v26 = vadd.f32 %v2510_v37, %v3393_v38 }
 0x64d   :  { %v2813_v39 = vpop.eup %2812  ;;  %v2189_v40 = vpop.f32.mrf.mxu0 }
 0x64e   :  { %2223 = vst.msk [vmem:[%s3496_s21 + $0x28] sm:$0xff] %vm2217_vm1, %v2813_v39  ;;  %2826 = vtanh.f32 %v2198_v26  ;;  %v2190_v42 = vadd.f32 %v3393_v38, %v2189_v40 }
 0x64f   :  { %v2815_v43 = vpop.eup %2814 }
 0x650   :  { %2228 = vst.msk [vmem:[%s3496_s21 + $0x50] sm:$0xff] %vm2217_vm1, %v2815_v43  ;;  %2828 = vtanh.f32 %v2190_v42 }
 0x651   :  { %v2817_v44 = vpop.eup %2816 }
 0x652   :  { %2226 = vst.msk [vmem:[%s3496_s21 + $0x40] sm:$0xff] %vm2217_vm1, %v2817_v44 }
 0x653   :  { %v2819_v45 = vpop.eup %2818 }
 0x654   :  { %2229 = vst.msk [vmem:[%s3496_s21 + $0x58] sm:$0xff] %vm2217_vm1, %v2819_v45 }
 0x655   :  { %v2821_v46 = vpop.eup %2820 }
 0x656   :  { %2227 = vst.msk [vmem:[%s3496_s21 + $0x48] sm:$0xff] %vm2217_vm1, %v2821_v46 }
 0x657   :  { %v2823_v47 = vpop.eup %2822 }
 0x658   :  { %2232 = vst.msk [vmem:[%s3496_s21 + $0x70] sm:$0xff] %vm2217_vm1, %v2823_v47 }
 0x659   :  { %v2825_v48 = vpop.eup %2824 }
 0x65a   :  { %2230 = vst.msk [vmem:[%s3496_s21 + $0x60] sm:$0xff] %vm2217_vm1, %v2825_v48 }
 0x65b   :  { %v2827_v29 = vpop.eup %2826 }
 0x65c   :  { %2233 = vst.msk [vmem:[%s3496_s21 + $0x78] sm:$0xff] %vm2217_vm1, %v2827_v29 }
 0x65d   :  { %v2829_v49 = vpop.eup %2828 }
 0x65e   :  { %2231 = vst.msk [vmem:[%s3496_s21 + $0x68] sm:$0xff] %vm2217_vm1, %v2829_v49 }
 0x65f   :  { %2238 = vsyncpa [#allocation3], 1 }
 0x660   :  { %2239 = vsyncpa [#allocation5], 1 }

</bundles_post_ra>
